<compile_context>
chip_gen: v7x
topology: tpu7x:2x2x1
jax: 0.10.0
libtpu: 0.0.40
codegen_flags: <defaults>
</compile_context>

<pallas_src>
import functools

import jax
import jax.numpy as jnp
from jax.experimental import pallas as pl
from jax.experimental.pallas import tpu as pltpu

EPS = 1e-5  # nn.LayerNorm / F.layer_norm default


def _gelu_tanh(x):
    # tanh-form GELU (|exact - tanh| <= ~5e-4); tanh runs on the EUP slot.
    c = 0.7978845608028654  # sqrt(2/pi)
    return 0.5 * x * (1.0 + jnp.tanh(c * (x + 0.044715 * x * x * x)))


def _round_up(n, m):
    return ((n + m - 1) // m) * m


def _pad_last(a, target):
    return jnp.pad(a, [(0, 0)] * (a.ndim - 1) + [(0, target - a.shape[-1])])


def _pick_tile_batch(batch, seq, kc, cp):
    """Batch elements per grid step: as many as a conservative VMEM budget
    allows, while keeping >=2 grid steps (pipelining / v7x's two TCs)."""
    # double-buffered bf16 input + f32 output blocks, plus ~3 live f32 temps
    per_b = seq * (2 * kc * 2 + 2 * cp * 4 + 3 * cp * 4)
    budget = 8 * 1024 * 1024          # far below even v7x's 64 MiB VMEM
    cap = max(1, min(batch, budget // max(per_b, 1)))
    if batch >= 2:
        cap = min(cap, batch // 2)
    tb = 1
    for d in range(1, batch + 1):
        if batch % d == 0 and d <= cap:
            tb = d
    return tb


# ---------------------------------------------------------------------------
# Kernel: TB batch elements per grid step.
# ---------------------------------------------------------------------------
def _lors_block_kernel(x_ref, w_ref, cb_ref, g1_ref, b1_ref,
                       wd_ref, bd_ref, wu_ref, bu_ref, o_ref,
                       *, c_out_real, tile_batch, seq_len):
    # x_ref : (TB*L, K*C_in) bf16  -- im2col rows of TB batch elements
    # w_ref : (K*C_in, Cp)   bf16  -- conv weight, channels zero-padded to Cp
    # o_ref : (TB, L, Cp)    f32
    inv_c = 1.0 / c_out_real

    # ---- Conv1d as a single deep matmul on the MXU (im2col in wrapper) ----
    acc = jnp.dot(x_ref[...], w_ref[...], preferred_element_type=jnp.float32)
    acc = acc + cb_ref[...]                     # padded channels stay exactly 0

    # ---- LayerNorm over channels: padded lanes contribute 0 to both sums,
    #      so divide by the real channel count. ----
    mu = jnp.sum(acc, axis=1, keepdims=True) * inv_c
    ex2 = jnp.sum(acc * acc, axis=1, keepdims=True) * inv_c
    var = ex2 - mu * mu
    h = (acc - mu) * jax.lax.rsqrt(var + EPS) * g1_ref[...] + b1_ref[...]

    # ---- GELU ----
    h = _gelu_tanh(h)                           # (TB*L, Cp) f32; padded lanes 0

    # ---- Layer_SE: per-batch average pool over L, small MLP (batched over the
    #      TB elements on the MXU), sigmoid gate. ----
    pooled = jnp.concatenate(
        [jnp.mean(h[t * seq_len:(t + 1) * seq_len, :], axis=0, keepdims=True)
         for t in range(tile_batch)], axis=0)   # (TB, Cp)
    d = jnp.dot(pooled.astype(jnp.bfloat16), wd_ref[...],
                preferred_element_type=jnp.float32) + bd_ref[...]
    d = _gelu_tanh(d)
    u = jnp.dot(d.astype(jnp.bfloat16), wu_ref[...],
                preferred_element_type=jnp.float32) + bu_ref[...]
    gate = jax.nn.sigmoid(u)                    # (TB, Cp)

    # ---- gate + final F.layer_norm over L (no affine); statically unrolled
    #      over the TB elements, all slices sublane-aligned (L % 8 == 0). ----
    for t in range(tile_batch):
        ht = h[t * seq_len:(t + 1) * seq_len, :] * gate[t:t + 1, :]   # (L, Cp)
        mu2 = jnp.mean(ht, axis=0, keepdims=True)
        var2 = jnp.mean((ht - mu2) ** 2, axis=0, keepdims=True)
        o_ref[t] = (ht - mu2) * jax.lax.rsqrt(var2 + EPS)


# ---------------------------------------------------------------------------
# Wrapper: layout plumbing + pallas_call
# ---------------------------------------------------------------------------
def lors_block(x, params, kernel_size):
    """x: (B, C_in, L) float32, returns (B, C_out, L) float32 (PyTorch layout)."""
    B, c_in, L = x.shape
    K = kernel_size
    assert K % 2 == 1, "Conv_1D uses padding=K//2; odd K keeps the length."
    pad = K // 2
    conv_w = params["conv_w"]                   # (C_out, C_in, K)
    c_out = conv_w.shape[0]
    c_int = params["wd"].shape[1]               # C_out // 2
    kc = K * c_in
    cp = _round_up(c_out, 128)                  # lane-dense channel dim

    # ---- layout plumbing (plain XLA; fused under jit) ----
    x_lc = jnp.transpose(x, (0, 2, 1))          # (B, L, C_in)
    x_pad = jnp.pad(x_lc, ((0, 0), (pad, pad), (0, 0)))
    # im2col: column order (tap k major, input channel minor) matches w_mat.
    x_col = jnp.concatenate([x_pad[:, k:k + L, :] for k in range(K)], axis=-1)
    x_col = x_col.reshape(B * L, kc).astype(jnp.bfloat16)

    w_mat = jnp.transpose(conv_w, (2, 1, 0)).reshape(kc, c_out)
    w_mat = _pad_last(w_mat, cp).astype(jnp.bfloat16)
    cb = _pad_last(params["conv_b"].reshape(1, c_out), cp)
    g1 = _pad_last(params["ln_g"].reshape(1, c_out), cp)
    b1 = _pad_last(params["ln_b"].reshape(1, c_out), cp)
    wd = jnp.pad(params["wd"], ((0, cp - c_out), (0, 0))).astype(jnp.bfloat16)
    bd = params["bd"].reshape(1, c_int)
    wu = _pad_last(params["wu"], cp).astype(jnp.bfloat16)
    bu = _pad_last(params["bu"].reshape(1, c_out), cp)

    tb = _pick_tile_batch(B, L, kc, cp)
    kernel = functools.partial(_lors_block_kernel,
                               c_out_real=c_out, tile_batch=tb, seq_len=L)

    out = pl.pallas_call(
        kernel,
        out_shape=jax.ShapeDtypeStruct((B, L, cp), jnp.float32),
        grid_spec=pltpu.PrefetchScalarGridSpec(
            num_scalar_prefetch=0,
            grid=(B // tb,),
            in_specs=[
                pl.BlockSpec((tb * L, kc), lambda b: (b, 0)),     # im2col rows
                pl.BlockSpec((kc, cp), lambda b: (0, 0)),         # conv weight
                pl.BlockSpec((1, cp), lambda b: (0, 0)),          # conv bias
                pl.BlockSpec((1, cp), lambda b: (0, 0)),          # ln gamma
                pl.BlockSpec((1, cp), lambda b: (0, 0)),          # ln beta
                pl.BlockSpec((cp, c_int), lambda b: (0, 0)),      # SE down W
                pl.BlockSpec((1, c_int), lambda b: (0, 0)),       # SE down b
                pl.BlockSpec((c_int, cp), lambda b: (0, 0)),      # SE up W
                pl.BlockSpec((1, cp), lambda b: (0, 0)),          # SE up b
            ],
            out_specs=pl.BlockSpec((tb, L, cp), lambda b: (b, 0, 0)),
        ),
        compiler_params=pltpu.CompilerParams(
            dimension_semantics=("parallel",),
            # fits v7x's 64 MiB VMEM; could be raised toward ~100 MiB on
            # v5e/v6e if per-step tiles are grown further.
            vmem_limit_bytes=64 * 1024 * 1024),
    )(x_col, w_mat, cb, g1, b1, wd, bd, wu, bu)

    out = out[:, :, :c_out]                      # drop channel padding
    return jnp.transpose(out, (0, 2, 1))         # back to (B, C_out, L)


# ---------------------------------------------------------------------------
# Pure-JAX reference (no Pallas) used to validate the kernel.
# With match_kernel_precision=True the conv / matmul operands are pre-rounded
# to bfloat16 (the kernel's intentional precision policy) so the comparison
# isolates implementation errors from the documented bf16 rounding.
# ---------------------------------------------------------------------------
def lors_block_reference(x, p, K, *, match_kernel_precision=False):
    def q(a):
        if match_kernel_precision:
            return a.astype(jnp.bfloat16).astype(jnp.float32)
        return a

    pad = K // 2
    y = jax.lax.conv_general_dilated(
        q(x), q(p["conv_w"]), window_strides=(1,), padding=[(pad, pad)],
        dimension_numbers=("NCH", "OIH", "NCH"))
    y = y + p["conv_b"][None, :, None]
    y = jnp.transpose(y, (0, 2, 1))              # (B, L, C)
    mu = y.mean(-1, keepdims=True)
    var = ((y - mu) ** 2).mean(-1, keepdims=True)
    y = (y - mu) / jnp.sqrt(var + EPS) * p["ln_g"] + p["ln_b"]
    y = jax.nn.gelu(y, approximate=False)        # PyTorch nn.GELU default (erf)
    pooled = y.mean(axis=1, keepdims=True)       # (B, 1, C)
    d = jax.nn.gelu(pooled @ q(p["wd"]) + p["bd"], approximate=False)
    gate = jax.nn.sigmoid(d @ q(p["wu"]) + p["bu"])
    y = y * gate
    mu2 = y.mean(axis=1, keepdims=True)          # normalize over L
    var2 = ((y - mu2) ** 2).mean(axis=1, keepdims=True)
    y = (y - mu2) / jnp.sqrt(var2 + EPS)
    return jnp.transpose(y, (0, 2, 1))           # (B, C, L)


if __name__ == "__main__":
    B, C_IN, C_OUT, L, K = 4, 16, 32, 64, 5
    C_INT = C_OUT // 2

    key = jax.random.PRNGKey(0)
    ks = jax.random.split(key, 10)

    # Deterministic synthetic parameters (shapes follow the PyTorch module).
    conv_w = 0.2 * jax.random.normal(ks[0], (C_OUT, C_IN, K), jnp.float32)
    conv_b = 0.1 * jax.random.normal(ks[1], (C_OUT,), jnp.float32)
    ln_g = 1.0 + 0.1 * jax.random.normal(ks[2], (C_OUT,), jnp.float32)
    ln_b = 0.1 * jax.random.normal(ks[3], (C_OUT,), jnp.float32)
    down_w = 0.3 * jax.random.normal(ks[4], (C_INT, C_OUT), jnp.float32)  # torch Linear weight
    down_b = 0.1 * jax.random.normal(ks[5], (C_INT,), jnp.float32)
    up_w = 0.3 * jax.random.normal(ks[6], (C_OUT, C_INT), jnp.float32)
    up_b = 0.1 * jax.random.normal(ks[7], (C_OUT,), jnp.float32)

    params = dict(conv_w=conv_w, conv_b=conv_b, ln_g=ln_g, ln_b=ln_b,
                  wd=down_w.T, bd=down_b, wu=up_w.T, bu=up_b)

    x = jax.random.normal(ks[8], (B, C_IN, L), jnp.float32)

    run = jax.jit(functools.partial(lors_block, kernel_size=K))
    out = jax.block_until_ready(run(x, params))
    assert out.shape == (B, C_OUT, L), out.shape

    # Tight check against a reference that uses the kernel's bf16 operand
    # policy (residual diff is only the tanh-GELU approximation, <~5e-3).
    ref_bf16 = lors_block_reference(x, params, K, match_kernel_precision=True)
    max_err = float(jnp.max(jnp.abs(out - ref_bf16)))
    assert jnp.allclose(out, ref_bf16, rtol=1e-2, atol=1e-2), max_err

    # Loose sanity check against the exact-f32 (PyTorch-faithful) reference;
    # the gap is the intentional bf16 rounding of activations / weights,
    # amplified by the two LayerNorms.
    ref_f32 = lors_block_reference(x, params, K, match_kernel_precision=False)
    assert float(jnp.max(jnp.abs(out - ref_f32))) < 0.15

    print("KERNEL_OK")
</pallas_src>

<mosaic_0001>
module attributes {stable_mosaic.version = 11 : i64} {
  func.func @_lors_block_kernel(%arg0: i32, %arg1: memref<128x80xbf16, #tpu.memory_space<vmem>>, %arg2: memref<80x128xbf16, #tpu.memory_space<vmem>>, %arg3: memref<1x128xf32, #tpu.memory_space<vmem>>, %arg4: memref<1x128xf32, #tpu.memory_space<vmem>>, %arg5: memref<1x128xf32, #tpu.memory_space<vmem>>, %arg6: memref<128x16xbf16, #tpu.memory_space<vmem>>, %arg7: memref<1x16xf32, #tpu.memory_space<vmem>>, %arg8: memref<16x128xbf16, #tpu.memory_space<vmem>>, %arg9: memref<1x128xf32, #tpu.memory_space<vmem>>, %arg10: memref<2x64x128xf32, #tpu.memory_space<vmem>>) attributes {dimension_semantics = [#tpu.dimension_semantics<parallel>], iteration_bounds = array<i64: 2>, scalar_prefetch = 0 : i64, scratch_operands = 0 : i64, tpu.core_type = #tpu.core_type<tc>, window_params = [{transform_indices = @transform_0, window_bounds = array<i64: 128, 80>}, {pipeline_mode = #tpu.pipeline_mode<synchronous>, transform_indices = @transform_1, window_bounds = array<i64: 80, 128>}, {pipeline_mode = #tpu.pipeline_mode<synchronous>, transform_indices = @transform_2, window_bounds = array<i64: 1, 128>}, {pipeline_mode = #tpu.pipeline_mode<synchronous>, transform_indices = @transform_3, window_bounds = array<i64: 1, 128>}, {pipeline_mode = #tpu.pipeline_mode<synchronous>, transform_indices = @transform_4, window_bounds = array<i64: 1, 128>}, {pipeline_mode = #tpu.pipeline_mode<synchronous>, transform_indices = @transform_5, window_bounds = array<i64: 128, 16>}, {pipeline_mode = #tpu.pipeline_mode<synchronous>, transform_indices = @transform_6, window_bounds = array<i64: 1, 16>}, {pipeline_mode = #tpu.pipeline_mode<synchronous>, transform_indices = @transform_7, window_bounds = array<i64: 16, 128>}, {pipeline_mode = #tpu.pipeline_mode<synchronous>, transform_indices = @transform_8, window_bounds = array<i64: 1, 128>}, {transform_indices = @transform_9, window_bounds = array<i64: 2, 64, 128>}]} {
    %c0 = arith.constant 0 : index
    %c0_0 = arith.constant 0 : index
    %0 = vector.load %arg1[%c0, %c0_0] : memref<128x80xbf16, #tpu.memory_space<vmem>>, vector<128x80xbf16>
    %c0_1 = arith.constant 0 : index
    %c0_2 = arith.constant 0 : index
    %1 = vector.load %arg2[%c0_1, %c0_2] : memref<80x128xbf16, #tpu.memory_space<vmem>>, vector<80x128xbf16>
    %cst = arith.constant dense<0.000000e+00> : vector<128x128xf32>
    %2 = tpu.matmul %0, %1, %cst {dimension_numbers = #tpu.dot_dimension_numbers<[1], [0], [0], [1], [0, 0, 1, 1], [], []>} : vector<128x80xbf16>, vector<80x128xbf16>, vector<128x128xf32> -> vector<128x128xf32>
    %c0_3 = arith.constant 0 : index
    %c0_4 = arith.constant 0 : index
    %3 = vector.load %arg3[%c0_3, %c0_4] : memref<1x128xf32, #tpu.memory_space<vmem>>, vector<1x128xf32>
    %4 = vector.broadcast %3 : vector<1x128xf32> to vector<128x128xf32>
    %5 = arith.addf %2, %4 : vector<128x128xf32>
    %cst_5 = arith.constant dense<0.000000e+00> : vector<128xf32>
    %6 = vector.multi_reduction <add>, %5, %cst_5 [1] : vector<128x128xf32> to vector<128xf32>
    %7 = vector.shape_cast %6 : vector<128xf32> to vector<128x1xf32>
    %cst_6 = arith.constant 3.125000e-02 : f32
    %8 = vector.broadcast %cst_6 : f32 to vector<128x1xf32>
    %9 = arith.mulf %7, %8 : vector<128x1xf32>
    %10 = arith.mulf %5, %5 : vector<128x128xf32>
    %cst_7 = arith.constant dense<0.000000e+00> : vector<128xf32>
    %11 = vector.multi_reduction <add>, %10, %cst_7 [1] : vector<128x128xf32> to vector<128xf32>
    %12 = vector.shape_cast %11 : vector<128xf32> to vector<128x1xf32>
    %cst_8 = arith.constant 3.125000e-02 : f32
    %13 = vector.broadcast %cst_8 : f32 to vector<128x1xf32>
    %14 = arith.mulf %12, %13 : vector<128x1xf32>
    %15 = arith.mulf %9, %9 : vector<128x1xf32>
    %16 = arith.subf %14, %15 : vector<128x1xf32>
    %17 = vector.broadcast %9 : vector<128x1xf32> to vector<128x128xf32>
    %18 = arith.subf %5, %17 : vector<128x128xf32>
    %cst_9 = arith.constant 9.99999974E-6 : f32
    %19 = vector.broadcast %cst_9 : f32 to vector<128x1xf32>
    %20 = arith.addf %16, %19 : vector<128x1xf32>
    %21 = math.rsqrt %20 : vector<128x1xf32>
    %22 = vector.broadcast %21 : vector<128x1xf32> to vector<128x128xf32>
    %23 = arith.mulf %18, %22 : vector<128x128xf32>
    %c0_10 = arith.constant 0 : index
    %c0_11 = arith.constant 0 : index
    %24 = vector.load %arg4[%c0_10, %c0_11] : memref<1x128xf32, #tpu.memory_space<vmem>>, vector<1x128xf32>
    %25 = vector.broadcast %24 : vector<1x128xf32> to vector<128x128xf32>
    %26 = arith.mulf %23, %25 : vector<128x128xf32>
    %c0_12 = arith.constant 0 : index
    %c0_13 = arith.constant 0 : index
    %27 = vector.load %arg5[%c0_12, %c0_13] : memref<1x128xf32, #tpu.memory_space<vmem>>, vector<1x128xf32>
    %28 = vector.broadcast %27 : vector<1x128xf32> to vector<128x128xf32>
    %29 = arith.addf %26, %28 : vector<128x128xf32>
    %cst_14 = arith.constant 5.000000e-01 : f32
    %30 = vector.broadcast %cst_14 : f32 to vector<128x128xf32>
    %31 = arith.mulf %30, %29 : vector<128x128xf32>
    %cst_15 = arith.constant 4.471500e-02 : f32
    %32 = vector.broadcast %cst_15 : f32 to vector<128x128xf32>
    %33 = arith.mulf %32, %29 : vector<128x128xf32>
    %34 = arith.mulf %33, %29 : vector<128x128xf32>
    %35 = arith.mulf %34, %29 : vector<128x128xf32>
    %36 = arith.addf %29, %35 : vector<128x128xf32>
    %cst_16 = arith.constant 0.797884583 : f32
    %37 = vector.broadcast %cst_16 : f32 to vector<128x128xf32>
    %38 = arith.mulf %37, %36 : vector<128x128xf32>
    %39 = math.tanh %38 : vector<128x128xf32>
    %cst_17 = arith.constant 1.000000e+00 : f32
    %40 = vector.broadcast %cst_17 : f32 to vector<128x128xf32>
    %41 = arith.addf %40, %39 : vector<128x128xf32>
    %42 = arith.mulf %31, %41 : vector<128x128xf32>
    %43 = vector.extract_strided_slice %42 {offsets = [0, 0], sizes = [64, 128], strides = [1, 1]} : vector<128x128xf32> to vector<64x128xf32>
    %cst_18 = arith.constant dense<0.000000e+00> : vector<128xf32>
    %44 = vector.multi_reduction <add>, %43, %cst_18 [0] : vector<64x128xf32> to vector<128xf32>
    %45 = vector.shape_cast %44 : vector<128xf32> to vector<1x128xf32>
    %cst_19 = arith.constant 6.400000e+01 : f32
    %46 = vector.broadcast %cst_19 : f32 to vector<1x128xf32>
    %47 = arith.divf %45, %46 : vector<1x128xf32>
    %48 = vector.extract_strided_slice %42 {offsets = [64, 0], sizes = [64, 128], strides = [1, 1]} : vector<128x128xf32> to vector<64x128xf32>
    %cst_20 = arith.constant dense<0.000000e+00> : vector<128xf32>
    %49 = vector.multi_reduction <add>, %48, %cst_20 [0] : vector<64x128xf32> to vector<128xf32>
    %50 = vector.shape_cast %49 : vector<128xf32> to vector<1x128xf32>
    %cst_21 = arith.constant 6.400000e+01 : f32
    %51 = vector.broadcast %cst_21 : f32 to vector<1x128xf32>
    %52 = arith.divf %50, %51 : vector<1x128xf32>
    %53 = tpu.concatenate %47, %52 in 0 : vector<1x128xf32>, vector<1x128xf32> -> vector<2x128xf32>
    %54 = arith.truncf %53 : vector<2x128xf32> to vector<2x128xbf16>
    %c0_22 = arith.constant 0 : index
    %c0_23 = arith.constant 0 : index
    %55 = vector.load %arg6[%c0_22, %c0_23] : memref<128x16xbf16, #tpu.memory_space<vmem>>, vector<128x16xbf16>
    %cst_24 = arith.constant dense<0.000000e+00> : vector<2x16xf32>
    %56 = tpu.matmul %54, %55, %cst_24 {dimension_numbers = #tpu.dot_dimension_numbers<[1], [0], [0], [1], [0, 0, 1, 1], [], []>} : vector<2x128xbf16>, vector<128x16xbf16>, vector<2x16xf32> -> vector<2x16xf32>
    %c0_25 = arith.constant 0 : index
    %c0_26 = arith.constant 0 : index
    %57 = vector.load %arg7[%c0_25, %c0_26] : memref<1x16xf32, #tpu.memory_space<vmem>>, vector<1x16xf32>
    %58 = vector.broadcast %57 : vector<1x16xf32> to vector<2x16xf32>
    %59 = arith.addf %56, %58 : vector<2x16xf32>
    %cst_27 = arith.constant 5.000000e-01 : f32
    %60 = vector.broadcast %cst_27 : f32 to vector<2x16xf32>
    %61 = arith.mulf %60, %59 : vector<2x16xf32>
    %cst_28 = arith.constant 4.471500e-02 : f32
    %62 = vector.broadcast %cst_28 : f32 to vector<2x16xf32>
    %63 = arith.mulf %62, %59 : vector<2x16xf32>
    %64 = arith.mulf %63, %59 : vector<2x16xf32>
    %65 = arith.mulf %64, %59 : vector<2x16xf32>
    %66 = arith.addf %59, %65 : vector<2x16xf32>
    %cst_29 = arith.constant 0.797884583 : f32
    %67 = vector.broadcast %cst_29 : f32 to vector<2x16xf32>
    %68 = arith.mulf %67, %66 : vector<2x16xf32>
    %69 = math.tanh %68 : vector<2x16xf32>
    %cst_30 = arith.constant 1.000000e+00 : f32
    %70 = vector.broadcast %cst_30 : f32 to vector<2x16xf32>
    %71 = arith.addf %70, %69 : vector<2x16xf32>
    %72 = arith.mulf %61, %71 : vector<2x16xf32>
    %73 = arith.truncf %72 : vector<2x16xf32> to vector<2x16xbf16>
    %c0_31 = arith.constant 0 : index
    %c0_32 = arith.constant 0 : index
    %74 = vector.load %arg8[%c0_31, %c0_32] : memref<16x128xbf16, #tpu.memory_space<vmem>>, vector<16x128xbf16>
    %cst_33 = arith.constant dense<0.000000e+00> : vector<2x128xf32>
    %75 = tpu.matmul %73, %74, %cst_33 {dimension_numbers = #tpu.dot_dimension_numbers<[1], [0], [0], [1], [0, 0, 1, 1], [], []>} : vector<2x16xbf16>, vector<16x128xbf16>, vector<2x128xf32> -> vector<2x128xf32>
    %c0_34 = arith.constant 0 : index
    %c0_35 = arith.constant 0 : index
    %76 = vector.load %arg9[%c0_34, %c0_35] : memref<1x128xf32, #tpu.memory_space<vmem>>, vector<1x128xf32>
    %77 = vector.broadcast %76 : vector<1x128xf32> to vector<2x128xf32>
    %78 = arith.addf %75, %77 : vector<2x128xf32>
    %79 = arith.negf %78 : vector<2x128xf32>
    %80 = math.exp %79 : vector<2x128xf32>
    %cst_36 = arith.constant 1.000000e+00 : f32
    %81 = vector.broadcast %cst_36 : f32 to vector<2x128xf32>
    %82 = arith.addf %81, %80 : vector<2x128xf32>
    %83 = arith.divf %81, %82 : vector<2x128xf32>
    %84 = vector.extract_strided_slice %42 {offsets = [0, 0], sizes = [64, 128], strides = [1, 1]} : vector<128x128xf32> to vector<64x128xf32>
    %85 = vector.extract_strided_slice %83 {offsets = [0, 0], sizes = [1, 128], strides = [1, 1]} : vector<2x128xf32> to vector<1x128xf32>
    %86 = vector.broadcast %85 : vector<1x128xf32> to vector<64x128xf32>
    %87 = arith.mulf %84, %86 : vector<64x128xf32>
    %cst_37 = arith.constant dense<0.000000e+00> : vector<128xf32>
    %88 = vector.multi_reduction <add>, %87, %cst_37 [0] : vector<64x128xf32> to vector<128xf32>
    %89 = vector.shape_cast %88 : vector<128xf32> to vector<1x128xf32>
    %cst_38 = arith.constant 6.400000e+01 : f32
    %90 = vector.broadcast %cst_38 : f32 to vector<1x128xf32>
    %91 = arith.divf %89, %90 : vector<1x128xf32>
    %92 = vector.broadcast %91 : vector<1x128xf32> to vector<64x128xf32>
    %93 = arith.subf %87, %92 : vector<64x128xf32>
    %94 = arith.mulf %93, %93 : vector<64x128xf32>
    %cst_39 = arith.constant dense<0.000000e+00> : vector<128xf32>
    %95 = vector.multi_reduction <add>, %94, %cst_39 [0] : vector<64x128xf32> to vector<128xf32>
    %96 = vector.shape_cast %95 : vector<128xf32> to vector<1x128xf32>
    %cst_40 = arith.constant 6.400000e+01 : f32
    %97 = vector.broadcast %cst_40 : f32 to vector<1x128xf32>
    %98 = arith.divf %96, %97 : vector<1x128xf32>
    %99 = vector.broadcast %91 : vector<1x128xf32> to vector<64x128xf32>
    %100 = arith.subf %87, %99 : vector<64x128xf32>
    %cst_41 = arith.constant 9.99999974E-6 : f32
    %101 = vector.broadcast %cst_41 : f32 to vector<1x128xf32>
    %102 = arith.addf %98, %101 : vector<1x128xf32>
    %103 = math.rsqrt %102 : vector<1x128xf32>
    %104 = vector.broadcast %103 : vector<1x128xf32> to vector<64x128xf32>
    %105 = arith.mulf %100, %104 : vector<64x128xf32>
    %c0_42 = arith.constant 0 : index
    %c0_43 = arith.constant 0 : index
    %c0_44 = arith.constant 0 : index
    %106 = vector.load %arg10[%c0_42, %c0_43, %c0_44] : memref<2x64x128xf32, #tpu.memory_space<vmem>>, vector<1x64x128xf32>
    %107 = vector.shape_cast %106 : vector<1x64x128xf32> to vector<64x128xf32>
    %108 = vector.shape_cast %105 : vector<64x128xf32> to vector<1x64x128xf32>
    tpu.vector_store %arg10[%c0_42, %c0_43, %c0_44], %108 {strides = array<i32>} : memref<2x64x128xf32, #tpu.memory_space<vmem>>, vector<1x64x128xf32>,
    %109 = vector.extract_strided_slice %42 {offsets = [64, 0], sizes = [64, 128], strides = [1, 1]} : vector<128x128xf32> to vector<64x128xf32>
    %110 = vector.extract_strided_slice %83 {offsets = [1, 0], sizes = [1, 128], strides = [1, 1]} : vector<2x128xf32> to vector<1x128xf32>
    %111 = vector.broadcast %110 : vector<1x128xf32> to vector<64x128xf32>
    %112 = arith.mulf %109, %111 : vector<64x128xf32>
    %cst_45 = arith.constant dense<0.000000e+00> : vector<128xf32>
    %113 = vector.multi_reduction <add>, %112, %cst_45 [0] : vector<64x128xf32> to vector<128xf32>
    %114 = vector.shape_cast %113 : vector<128xf32> to vector<1x128xf32>
    %cst_46 = arith.constant 6.400000e+01 : f32
    %115 = vector.broadcast %cst_46 : f32 to vector<1x128xf32>
    %116 = arith.divf %114, %115 : vector<1x128xf32>
    %117 = vector.broadcast %116 : vector<1x128xf32> to vector<64x128xf32>
    %118 = arith.subf %112, %117 : vector<64x128xf32>
    %119 = arith.mulf %118, %118 : vector<64x128xf32>
    %cst_47 = arith.constant dense<0.000000e+00> : vector<128xf32>
    %120 = vector.multi_reduction <add>, %119, %cst_47 [0] : vector<64x128xf32> to vector<128xf32>
    %121 = vector.shape_cast %120 : vector<128xf32> to vector<1x128xf32>
    %cst_48 = arith.constant 6.400000e+01 : f32
    %122 = vector.broadcast %cst_48 : f32 to vector<1x128xf32>
    %123 = arith.divf %121, %122 : vector<1x128xf32>
    %124 = vector.broadcast %116 : vector<1x128xf32> to vector<64x128xf32>
    %125 = arith.subf %112, %124 : vector<64x128xf32>
    %cst_49 = arith.constant 9.99999974E-6 : f32
    %126 = vector.broadcast %cst_49 : f32 to vector<1x128xf32>
    %127 = arith.addf %123, %126 : vector<1x128xf32>
    %128 = math.rsqrt %127 : vector<1x128xf32>
    %129 = vector.broadcast %128 : vector<1x128xf32> to vector<64x128xf32>
    %130 = arith.mulf %125, %129 : vector<64x128xf32>
    %c1 = arith.constant 1 : index
    %c0_50 = arith.constant 0 : index
    %c0_51 = arith.constant 0 : index
    %131 = vector.load %arg10[%c1, %c0_50, %c0_51] : memref<2x64x128xf32, #tpu.memory_space<vmem>>, vector<1x64x128xf32>
    %132 = vector.shape_cast %131 : vector<1x64x128xf32> to vector<64x128xf32>
    %133 = vector.shape_cast %130 : vector<64x128xf32> to vector<1x64x128xf32>
    tpu.vector_store %arg10[%c1, %c0_50, %c0_51], %133 {strides = array<i32>} : memref<2x64x128xf32, #tpu.memory_space<vmem>>, vector<1x64x128xf32>,
    return
  }
  func.func @transform_0(%arg0: i32) -> (i32, i32) {
    %c0_i32 = arith.constant 0 : i32
    %c0_i32_0 = arith.constant 0 : i32
    return %arg0, %c0_i32 : i32, i32
  }
  func.func @transform_1(%arg0: i32) -> (i32, i32) {
    %c0_i32 = arith.constant 0 : i32
    %c0_i32_0 = arith.constant 0 : i32
    %c0_i32_1 = arith.constant 0 : i32
    return %c0_i32, %c0_i32_0 : i32, i32
  }
  func.func @transform_2(%arg0: i32) -> (i32, i32) {
    %c0_i32 = arith.constant 0 : i32
    %c0_i32_0 = arith.constant 0 : i32
    %c0_i32_1 = arith.constant 0 : i32
    return %c0_i32, %c0_i32_0 : i32, i32
  }
  func.func @transform_3(%arg0: i32) -> (i32, i32) {
    %c0_i32 = arith.constant 0 : i32
    %c0_i32_0 = arith.constant 0 : i32
    %c0_i32_1 = arith.constant 0 : i32
    return %c0_i32, %c0_i32_0 : i32, i32
  }
  func.func @transform_4(%arg0: i32) -> (i32, i32) {
    %c0_i32 = arith.constant 0 : i32
    %c0_i32_0 = arith.constant 0 : i32
    %c0_i32_1 = arith.constant 0 : i32
    return %c0_i32, %c0_i32_0 : i32, i32
  }
  func.func @transform_5(%arg0: i32) -> (i32, i32) {
    %c0_i32 = arith.constant 0 : i32
    %c0_i32_0 = arith.constant 0 : i32
    %c0_i32_1 = arith.constant 0 : i32
    return %c0_i32, %c0_i32_0 : i32, i32
  }
  func.func @transform_6(%arg0: i32) -> (i32, i32) {
    %c0_i32 = arith.constant 0 : i32
    %c0_i32_0 = arith.constant 0 : i32
    %c0_i32_1 = arith.constant 0 : i32
    return %c0_i32, %c0_i32_0 : i32, i32
  }
  func.func @transform_7(%arg0: i32) -> (i32, i32) {
    %c0_i32 = arith.constant 0 : i32
    %c0_i32_0 = arith.constant 0 : i32
    %c0_i32_1 = arith.constant 0 : i32
    return %c0_i32, %c0_i32_0 : i32, i32
  }
  func.func @transform_8(%arg0: i32) -> (i32, i32) {
    %c0_i32 = arith.constant 0 : i32
    %c0_i32_0 = arith.constant 0 : i32
    %c0_i32_1 = arith.constant 0 : i32
    return %c0_i32, %c0_i32_0 : i32, i32
  }
  func.func @transform_9(%arg0: i32) -> (i32, i32, i32) {
    %c0_i32 = arith.constant 0 : i32
    %c0_i32_0 = arith.constant 0 : i32
    %c0_i32_1 = arith.constant 0 : i32
    return %arg0, %c0_i32, %c0_i32_0 : i32, i32, i32
  }
}

</mosaic_0001>

<bundles_post_ra>
// kernel: lors_block.1
= control target key start
LH: loop header
LB: loop body
LE: loop exit
PB: predicated region body
PF: predicated region fallthrough
CT: control target
= control target key end

     0   :  { %s3279_s0 = inlined_call_operand.hbm [shape: bf16[256,80], index: 0, kind: input, shape index: {}]   ;;  %s3280_s1 = inlined_call_operand.hbm [shape: bf16[80,128], index: 1, kind: input, shape index: {}]   ;;  %s3281_s2 = inlined_call_operand.hbm [shape: f32[1,128], index: 2, kind: input, shape index: {}]   ;;  %s3282_s3 = inlined_call_operand.hbm [shape: f32[1,128], index: 3, kind: input, shape index: {}]   ;;  %s3283_s4 = inlined_call_operand.hbm [shape: f32[1,128], index: 4, kind: input, shape index: {}]   ;;  %s3284_s5 = inlined_call_operand.hbm [shape: bf16[128,16], index: 5, kind: input, shape index: {}]   ;;  %s3285_s6 = inlined_call_operand.hbm [shape: f32[1,16], index: 6, kind: input, shape index: {}]   ;;  %s3286_s7 = inlined_call_operand.hbm [shape: bf16[16,128], index: 7, kind: input, shape index: {}]   ;;  %s3287_s8 = inlined_call_operand.hbm [shape: f32[1,128], index: 8, kind: input, shape index: {}]   ;;  %s3288_s9 = inlined_call_operand.hbm [shape: f32[4,64,128], index: 9, kind: output, shape index: {}]  }
   0x1   :  { %3294 = sst [smem:[#allocation24_spill]] %s3280_s1 }
   0x2   :  { %3295 = sst [smem:[#allocation25_spill]] %s3288_s9 }
   0x3   :  { %14 = vsyncpa [#allocation3], 0 }
   0x4   :  { %16 = vsyncpa [#allocation3 + $0x1], 0 }
   0x5   :  { %17 = vsyncpa [#allocation6], 0 }
   0x6   :  { %18 = vsyncpa [#allocation9], 0 }
   0x7   :  { %19 = vsyncpa [#allocation12], 0 }
   0x8   :  { %20 = vsyncpa [#allocation15], 0 }
   0x9   :  { %21 = vsyncpa [#allocation4], 0 }
   0xa   :  { %23 = vsyncpa [#allocation4 + $0x1], 0  ;;  %s2402_s30 = smov 0   ;;  %s2404_s10 = smov 0  }
   0xb   :  { %s2406_s11 = smov 0   ;;  %s2408_s12 = smov 0  }
   0xc LB: > { %s2336_s13 = smov [#allocation5]   ;;  %s2423_s15 = sadd.s32 4294967295, %s2334_s12   ;;  %s2334_s12 = sphi %s2408_s12, %s3323_s12   ;;  %s2330_s11 = sphi %s2406_s11, %s3322_s11   ;;  %s2326_s10 = sphi %s2404_s10, %s3321_s10   ;;  %s2322_s30 = sphi %s2402_s30, %s3320_s30  }
   0xd   : > { %s266_s14 = sshll.u32 %s2336_s13, 4  ;;  %p1615_p0 = scmp.ge.s32.totalorder %s2334_s12, 1  ;;  %s2428_s14 = int_to_ptr.vmem [resolvable:$true] %s266_s14 }
   0xe   : > { %p3290_p1 = scmp.eq.s32.totalorder %s2423_s15, 0  ;;  %p254_p2 = scmp.lt.s32.totalorder %s2334_s12, 3 }
   0xf   : > { %s2337_s17 = smov [#allocation8]   ;;  %s2338_s20 = smov [#allocation11]  }
  0x10   : > { %p2430_p3 = pnand %p1615_p0, %p254_p2  ;;  %s291_s18 = sshll.u32 %s2337_s17, 4  ;;  %s2443_s18 = int_to_ptr.vmem [resolvable:$true] %s291_s18 }
  0x11   : > { %s312_s21 = sshll.u32 %s2338_s20, 4  ;;  %s3298_s1 = sld [smem:[#allocation24_spill]]  ;;  %s2445_s21 = int_to_ptr.vmem [resolvable:$true] %s312_s21 }
  0x12   : > { %s3296_s16 = scalar_select %p2430_p3, 1, 0 }
  0x13   : > { %p1805_p5 = pneg %p2430_p3 }
  0x15   : > { %p2439_p6 = pnand %p1805_p5, %p3290_p1 }
  0x17   : > { %s1998_s24 = scalar_lea.hbm %s3298_s1, 640  ;;  %p2455_p8 = pneg %p2439_p6 }
  0x18   : > { %p1999_p7 = scmp.ne.s32.totalorder %s3298_s1, %s1998_s24  ;;  %p2005_p11 = scmp.lt.u32.totalorder %s1998_s24, %s3298_s1 }
  0x1a   : > { %p2001_p9 = pnand %p2455_p8, %p1999_p7 }
  0x1c   : > { %p2002_p10 = pneg %p2001_p9 }
  0x1e   : > { %p2007_p12 = pnand %p2005_p11, %p2002_p10 }
  0x20   : > { %2010 = shalt.err (!%p2007_p12)
}
  0x21   : > { %s2011_s13 = scalar_lea.vmem %s2428_s14, 640  ;;  %p2019_p5 = scmp.lt.s32.totalorder %s2428_s14, %s2428_s14 }
  0x22   : > { %p2012_p13 = scmp.ne.s32.totalorder %s2428_s14, %s2011_s13  ;;  %p2020_p4 = scmp.lt.s32.totalorder %s2011_s13, %s2011_s13 }
  0x24   : > { %p2014_p0 = pnand %p2012_p13, %p2455_p8  ;;  %p2021_p7 = por %p2020_p4, %p2019_p5 }
  0x26   : > { %p2015_p2 = pneg %p2014_p0 }
  0x28   : > { %p2022_p9 = pnand %p2021_p7, %p2015_p2 }
  0x2a   : > { %2025 = shalt.err (!%p2022_p9)
}
  0x2b   : > { %s3292_s17 = smov 64   ;;  %s2340_s20 = smov 4  }
  0x2c   : > { %1808 = dma.hbm_to_vmem [thread:$0]  (!%p2439_p6), %s3298_s1, 640, %s2428_s14, [#allocation6], %s3292_s17, %s3292_s17, %s2340_s20  }
  0x2d   : > { %s2026_s26 = scalar_lea.hbm %s3282_s3, 16 }
  0x2e   : > { %p2027_p4 = scmp.ne.s32.totalorder %s3282_s3, %s2026_s26  ;;  %p2033_p12 = scmp.lt.u32.totalorder %s2026_s26, %s3282_s3 }
  0x30   : > { %p2029_p10 = pnand %p2027_p4, %p2455_p8 }
  0x32   : > { %p2030_p11 = pneg %p2029_p10 }
  0x34   : > { %p2035_p13 = pnand %p2033_p12, %p2030_p11 }
  0x36   : > { %2038 = shalt.err (!%p2035_p13)
}
  0x37   : > { %s2039_s14 = scalar_lea.vmem %s2443_s18, 16  ;;  %s2046_s22 = scalar_lea.vmem %s2443_s18, 32 }
  0x38   : > { %p2040_p0 = scmp.ne.s32.totalorder %s2443_s18, %s2039_s14  ;;  %p2047_p7 = scmp.lt.s32.totalorder %s2443_s18, %s2443_s18 }
  0x39   : > { %p2048_p9 = scmp.lt.s32.totalorder %s2046_s22, %s2039_s14 }
  0x3a   : > { %p2042_p2 = pnand %p2040_p0, %p2455_p8 }
  0x3b   : > { %p2049_p4 = por %p2048_p9, %p2047_p7 }
  0x3c   : > { %p2043_p5 = pneg %p2042_p2 }
  0x3e   : > { %p2050_p10 = pnand %p2049_p4, %p2043_p5 }
  0x40   : > { %2053 = shalt.err (!%p2050_p10)
}
  0x41   : > { %1814 = dma.hbm_to_vmem [thread:$0]  (!%p2439_p6), %s3282_s3, 16, %s2443_s18, [#allocation9]  }
  0x42   : > { %s2054_s26 = scalar_lea.hbm %s3284_s5, 1024 }
  0x43   : > { %p2055_p11 = scmp.ne.s32.totalorder %s3284_s5, %s2054_s26  ;;  %p2061_p0 = scmp.lt.u32.totalorder %s2054_s26, %s3284_s5 }
  0x45   : > { %p2057_p12 = pnand %p2055_p11, %p2455_p8 }
  0x47   : > { %p2058_p13 = pneg %p2057_p12 }
  0x49   : > { %p2063_p2 = pnand %p2061_p0, %p2058_p13 }
  0x4b   : > { %2066 = shalt.err (!%p2063_p2)
}
  0x4c   : > { %s2067_s18 = scalar_lea.vmem %s2445_s21, 1024  ;;  %p2075_p4 = scmp.lt.s32.totalorder %s2445_s21, %s2445_s21 }
  0x4d   : > { %p2068_p5 = scmp.ne.s32.totalorder %s2445_s21, %s2067_s18  ;;  %p2076_p10 = scmp.lt.s32.totalorder %s2067_s18, %s2067_s18 }
  0x4f   : > { %p2070_p7 = pnand %p2068_p5, %p2455_p8  ;;  %p2077_p11 = por %p2076_p10, %p2075_p4 }
  0x51   : > { %p2071_p9 = pneg %p2070_p7 }
  0x53   : > { %p2078_p12 = pnand %p2077_p11, %p2071_p9 }
  0x55   : > { %2081 = shalt.err (!%p2078_p12)
}
  0x56   : > { %1820 = dma.hbm_to_vmem [thread:$0]  (!%p2439_p6), %s3284_s5, 1024, %s2445_s21, [#allocation12], %s3292_s17, %s3292_s17, %s2340_s20  }
  0x57   : > { %s2341_s23 = smov [#allocation14]   ;;  %s2342_s25 = smov [#allocation7]  }
  0x58   : > { %s336_s24 = sshll.u32 %s2341_s23, 4  ;;  %s280_s26 = sshll.u32 %s2342_s25, 4  ;;  %s337_s24 = int_to_ptr.vmem [resolvable:$true] %s336_s24  ;;  %s281_s26 = int_to_ptr.vmem [resolvable:$true] %s280_s26 }
  0x59   : > { %s2082_s13 = scalar_lea.hbm %s3286_s7, 128 }
  0x5a   : > { %p2083_p13 = scmp.ne.s32.totalorder %s3286_s7, %s2082_s13  ;;  %p2089_p5 = scmp.lt.u32.totalorder %s2082_s13, %s3286_s7 }
  0x5c   : > { %p2085_p0 = pnand %p2083_p13, %p2455_p8 }
  0x5e   : > { %p2086_p2 = pneg %p2085_p0 }
  0x60   : > { %p2091_p7 = pnand %p2089_p5, %p2086_p2 }
  0x62   : > { %2094 = shalt.err (!%p2091_p7)
}
  0x63   : > { %s2095_s21 = scalar_lea.vmem %s337_s24, 128  ;;  %p2103_p11 = scmp.lt.s32.totalorder %s337_s24, %s337_s24 }
  0x64   : > { %p2096_p9 = scmp.ne.s32.totalorder %s337_s24, %s2095_s21  ;;  %p2104_p12 = scmp.lt.s32.totalorder %s2095_s21, %s2095_s21 }
  0x66   : > { %p2098_p4 = pnand %p2096_p9, %p2455_p8  ;;  %p2105_p1 = por %p2104_p12, %p2103_p11 }
  0x68   : > { %p2099_p10 = pneg %p2098_p4 }
  0x6a   : > { %p2106_p3 = pnand %p2105_p1, %p2099_p10 }
  0x6c   : > { %2109 = shalt.err (!%p2106_p3)
}
  0x6d   : > { %1826 = dma.hbm_to_vmem [thread:$0]  (!%p2439_p6), %s3286_s7, 128, %s337_s24, [#allocation15], %s3292_s17, %s3292_s17, %s2340_s20  }
  0x6e   : > { %s2110_s28 = scalar_lea.hbm %s3281_s2, 16 }
  0x6f   : > { %p2111_p1 = scmp.ne.s32.totalorder %s3281_s2, %s2110_s28  ;;  %p2117_p0 = scmp.lt.u32.totalorder %s2110_s28, %s3281_s2 }
  0x71   : > { %p2113_p3 = pnand %p2111_p1, %p2455_p8 }
  0x73   : > { %p2114_p13 = pneg %p2113_p3 }
  0x75   : > { %p2119_p2 = pnand %p2117_p0, %p2114_p13 }
  0x77   : > { %2122 = shalt.err (!%p2119_p2)
}
  0x78   : > { %s2123_s22 = scalar_lea.vmem %s281_s26, 16  ;;  %s2130_s24 = scalar_lea.vmem %s281_s26, 32 }
  0x79   : > { %p2124_p5 = scmp.ne.s32.totalorder %s281_s26, %s2123_s22  ;;  %p2131_p4 = scmp.lt.s32.totalorder %s281_s26, %s281_s26 }
  0x7a   : > { %p2132_p10 = scmp.lt.s32.totalorder %s2130_s24, %s2123_s22 }
  0x7b   : > { %p2126_p7 = pnand %p2124_p5, %p2455_p8 }
  0x7c   : > { %p2133_p11 = por %p2132_p10, %p2131_p4 }
  0x7d   : > { %p2127_p9 = pneg %p2126_p7 }
  0x7f   : > { %p2134_p12 = pnand %p2133_p11, %p2127_p9 }
  0x81   : > { %2137 = shalt.err (!%p2134_p12)
}
  0x82   : > { %1811 = dma.hbm_to_vmem [thread:$0]  (!%p2439_p6), %s3281_s2, 16, %s281_s26, [#allocation6]  }
  0x83   : > { %s2343_s9 = smov [#allocation10]   ;;  %s2344_s25 = smov [#allocation13]  }
  0x84   : > { %s302_s23 = sshll.u32 %s2343_s9, 4  ;;  %s326_s28 = sshll.u32 %s2344_s25, 4  ;;  %s303_s23 = int_to_ptr.vmem [resolvable:$true] %s302_s23  ;;  %s327_s28 = int_to_ptr.vmem [resolvable:$true] %s326_s28 }
  0x85   : > { %s2138_s14 = scalar_lea.hbm %s3283_s4, 16 }
  0x86   : > { %p2139_p1 = scmp.ne.s32.totalorder %s3283_s4, %s2138_s14  ;;  %p2145_p0 = scmp.lt.u32.totalorder %s2138_s14, %s3283_s4 }
  0x88   : > { %p2141_p3 = pnand %p2139_p1, %p2455_p8 }
  0x8a   : > { %p2142_p13 = pneg %p2141_p3 }
  0x8c   : > { %p2147_p2 = pnand %p2145_p0, %p2142_p13 }
  0x8e   : > { %2150 = shalt.err (!%p2147_p2)
}
  0x8f   : > { %s2151_s26 = scalar_lea.vmem %s303_s23, 16  ;;  %s2158_s1 = scalar_lea.vmem %s303_s23, 32 }
  0x90   : > { %p2152_p5 = scmp.ne.s32.totalorder %s303_s23, %s2151_s26  ;;  %p2159_p4 = scmp.lt.s32.totalorder %s303_s23, %s303_s23 }
  0x91   : > { %p2160_p10 = scmp.lt.s32.totalorder %s2158_s1, %s2151_s26 }
  0x92   : > { %p2154_p7 = pnand %p2152_p5, %p2455_p8 }
  0x93   : > { %p2161_p11 = por %p2160_p10, %p2159_p4 }
  0x94   : > { %p2155_p9 = pneg %p2154_p7 }
  0x96   : > { %p2162_p12 = pnand %p2161_p11, %p2155_p9 }
  0x98   : > { %2165 = shalt.err (!%p2162_p12)
}
  0x99   : > { %1817 = dma.hbm_to_vmem [thread:$0]  (!%p2439_p6), %s3283_s4, 16, %s303_s23, [#allocation9]  }
  0x9a   : > { %s2166_s14 = scalar_lea.hbm %s3285_s6, 16 }
  0x9b   : > { %p2167_p1 = scmp.ne.s32.totalorder %s3285_s6, %s2166_s14  ;;  %p2173_p0 = scmp.lt.u32.totalorder %s2166_s14, %s3285_s6 }
  0x9d   : > { %p2169_p3 = pnand %p2167_p1, %p2455_p8 }
  0x9f   : > { %p2170_p13 = pneg %p2169_p3 }
  0xa1   : > { %p2175_p2 = pnand %p2173_p0, %p2170_p13 }
  0xa3   : > { %2178 = shalt.err (!%p2175_p2)
}
  0xa4   : > { %s2179_s26 = scalar_lea.vmem %s327_s28, 16  ;;  %s2186_s23 = scalar_lea.vmem %s327_s28, 32 }
  0xa5   : > { %p2180_p5 = scmp.ne.s32.totalorder %s327_s28, %s2179_s26  ;;  %p2187_p4 = scmp.lt.s32.totalorder %s327_s28, %s327_s28 }
  0xa6   : > { %p2188_p10 = scmp.lt.s32.totalorder %s2186_s23, %s2179_s26 }
  0xa7   : > { %p2182_p7 = pnand %p2180_p5, %p2455_p8 }
  0xa8   : > { %p2189_p11 = por %p2188_p10, %p2187_p4 }
  0xa9   : > { %p2183_p9 = pneg %p2182_p7 }
  0xab   : > { %p2190_p12 = pnand %p2189_p11, %p2183_p9 }
  0xad   : > { %2193 = shalt.err (!%p2190_p12)
}
  0xae   : > { %1823 = dma.hbm_to_vmem [thread:$0]  (!%p2439_p6), %s3285_s6, 16, %s327_s28, [#allocation12]  }
  0xaf   : > { %s2345_s25 = smov [#allocation16]   ;;  %s2194_s18 = scalar_lea.hbm %s3287_s8, 16 }
  0xb0   : > { %s350_s29 = sshll.u32 %s2345_s25, 4  ;;  %p2195_p1 = scmp.ne.s32.totalorder %s3287_s8, %s2194_s18  ;;  %s351_s29 = int_to_ptr.vmem [resolvable:$true] %s350_s29 }
  0xb1   : > { %p2201_p0 = scmp.lt.u32.totalorder %s2194_s18, %s3287_s8 }
  0xb2   : > { %p2197_p3 = pnand %p2195_p1, %p2455_p8 }
  0xb4   : > { %p2198_p13 = pneg %p2197_p3 }
  0xb6   : > { %p2203_p2 = pnand %p2201_p0, %p2198_p13 }
  0xb8   : > { %2206 = shalt.err (!%p2203_p2)
}
  0xb9   : > { %s2207_s28 = scalar_lea.vmem %s351_s29, 16  ;;  %s2214_s23 = scalar_lea.vmem %s351_s29, 32 }
  0xba   : > { %p2208_p5 = scmp.ne.s32.totalorder %s351_s29, %s2207_s28  ;;  %p2215_p4 = scmp.lt.s32.totalorder %s351_s29, %s351_s29 }
  0xbb   : > { %p2216_p10 = scmp.lt.s32.totalorder %s2214_s23, %s2207_s28 }
  0xbc   : > { %p2210_p7 = pnand %p2208_p5, %p2455_p8 }
  0xbd   : > { %p2217_p11 = por %p2216_p10, %p2215_p4 }
  0xbe   : > { %p2211_p9 = pneg %p2210_p7 }
  0xc0   : > { %p2218_p12 = pnand %p2217_p11, %p2211_p9 }
  0xc2   : > { %2221 = shalt.err (!%p2218_p12)
}
  0xc3   : > { %1829 = dma.hbm_to_vmem [thread:$0]  (!%p2439_p6), %s3287_s8, 16, %s351_s29, [#allocation15]  }
  0xc4   : > { %s1614_s27 = sadd.s32 4294967294, %s2334_s12   ;;  %s2624_s19 = sadd.s32 1, %s2334_s12  }
  0xc5   : > { %s33_s25 = ssub.s32 %s2334_s12, %s2624_s19  ;;  %s36_s13 = sadd.s32 1, %s2330_s11 }
  0xc6   : > { %p34_p8 = scmp.eq.s32.totalorder %s33_s25, 0  ;;  %p43_p1 = scmp.ne.s32.totalorder %s2330_s11, %s2326_s10 }
  0xc7   : > { %p44_p3 = scmp.eq.s32.totalorder %s2334_s12, 0  ;;  %p49_p13 = scmp.ne.s32.totalorder %s2326_s10, %s2322_s30 }
  0xc8   : > { %s2635_s14 = scalar_select %p34_p8, %s2330_s11, %s36_s13  }
  0xc9   : > { %p2637_p0 = por %p44_p3, %p43_p1  ;;  %p3301_p2 = scmp.eq.s32.totalorder %s2423_s15, 0 }
  0xca   : > { %p241_p5 = scmp.eq.s32.totalorder %s2423_s15, 1  ;;  %p247_p7 = scmp.eq.s32.totalorder %s1614_s27, 1 }
  0xcb   : > { %p2643_p6 = por %p3301_p2, %p49_p13  ;;  %p1846_p9 = scmp.lt.s32.totalorder %s2334_s12, 2 }
  0xcc   : > { %s361_s22 = sand.u32 1, %s2330_s11   ;;  %p2650_p4 = por %p241_p5, %p43_p1 }
  0xcd   : > { %p2654_p10 = por %p247_p7, %p49_p13  ;;  %s1625_s26 = sshll.u32 %s361_s22, 6 }
  0xce   : > { %s3303_s24 = scalar_select %p2650_p4, 1, 0 }
  0xcf   : > { %s3304_s21 = scalar_select %p2654_p10, 1, 0 }
  0xd0   : > { %s1690_s28 = sshll.u32 %s2334_s12, 10  ;;  %s365_s27 = scalar_lea.vmem [#allocation2], %s1625_s26 }
  0xd1   : > { %s2662_s9 = scalar_lea.hbm %s3279_s0, %s1690_s28  ;;  %s372_s25 = sshll.u32 %s365_s27, 4  ;;  %s2664_s25 = int_to_ptr.vmem [resolvable:$true] %s372_s25 }
  0xd2   : > { %p2668_p11 = pnand %p1846_p9, %p2637_p0  ;;  %s2672_s17 = scalar_lea.sflag [#allocation3], %s361_s22 }
  0xd3   : > { %s2222_s23 = scalar_lea.hbm %s2662_s9, 1024  ;;  %s2227_s18 = scalar_lea.hbm %s3279_s0, 2048 }
  0xd4   : > { %p2223_p12 = scmp.ne.s32.totalorder %s2662_s9, %s2222_s23  ;;  %p2224_p8 = pneg %p2668_p11 }
  0xd5   : > { %p2228_p13 = scmp.lt.u32.totalorder %s2662_s9, %s3279_s0  ;;  %p2229_p0 = scmp.lt.u32.totalorder %s2227_s18, %s2222_s23 }
  0xd6   : > { %p2225_p1 = pnand %p2224_p8, %p2223_p12  ;;  %p2231_p5 = scmp.lt.u32.totalorder %s2222_s23, %s2662_s9 }
  0xd7   : > { %p2230_p2 = por %p2229_p0, %p2228_p13 }
  0xd8   : > { %p2226_p3 = pneg %p2225_p1 }
  0xd9   : > { %p2232_p7 = por %p2231_p5, %p2230_p2 }
  0xdb   : > { %p2233_p9 = pnand %p2232_p7, %p2226_p3 }
  0xdd   : > { %2236 = shalt.err (!%p2233_p9)
}
  0xde   : > { %s2237_s22 = scalar_lea.vmem %s2664_s25, 1024  ;;  %s2346_s26 = smov [#allocation2]  }
  0xdf   : > { %p2238_p12 = scmp.ne.s32.totalorder %s2664_s25, %s2237_s22  ;;  %s2242_s28 = sshll.u32 %s2346_s26, 4  ;;  %s2243_s28 = int_to_ptr.vmem [resolvable:$false] %s2242_s28 }
  0xe0   : > { %s2244_s1 = scalar_lea.vmem %s2243_s28, 2048  ;;  %p2245_p4 = scmp.lt.s32.totalorder %s2664_s25, %s2243_s28 }
  0xe1   : > { %p2240_p1 = pnand %p2238_p12, %p2224_p8  ;;  %p2246_p13 = scmp.lt.s32.totalorder %s2244_s1, %s2237_s22 }
  0xe3   : > { %p2241_p10 = pneg %p2240_p1  ;;  %p2247_p0 = por %p2246_p13, %p2245_p4 }
  0xe5   : > { %p2248_p2 = pnand %p2247_p0, %p2241_p10 }
  0xe7   : > { %2251 = shalt.err (!%p2248_p2)
}
  0xe8   : > { %s3306_s23 = smov 64   ;;  %p3307_p8 = scmp.ne.s32.totalorder %s3296_s16, 0 }
  0xe9   : > { %1833 = dma.hbm_to_vmem [thread:$0]  (!%p2668_p11), %s2662_s9, 1024, %s2664_s25, %s2672_s17, %s3306_s23, %s3306_s23, %s2340_s20  }
  0xea   : > { %384 = sbr.rel (%p3307_p8) target bundleno = 1353 (0x549), region = 56  ;;  %s2706_s18 = sand.u32 (!%p3307_p8), 1, %s2326_s10  }
  0xeb   : > { %s1629_s27 = sshll.u32 (!%p3307_p8), %s2706_s18, 6  ;;  %s387_s22 = scalar_lea.sflag (!%p3307_p8), [#allocation3], %s2706_s18 }
  0xec   : > { %s2710_s26 = scalar_lea.vmem (!%p3307_p8), [#allocation2], %s1629_s27 }
  0xf1   : > { %2297 = dma.done.wait (%p2643_p6), %s387_s22, 1024  }
  0xf2   : > { %2299 = vsyncadd (%p2643_p6), %s387_s22, 4294966272  ;;  %p3308_p4 = scmp.eq.s32.totalorder %s2423_s15, 0 }
  0xf4   : > { %2301 = dma.done.wait (%p3308_p4), [#allocation6], 656   ;;  %p3309_p10 = pmov %p3308_p4 }
  0xf5   : > { %p3310_p11 = pmov %p3308_p4 }
  0xf6   : > { %2303 = vsyncadd (%p3309_p10), [#allocation6], 4294966640 }
  0xf7   : > { %2305 = dma.done.wait (%p3310_p11), [#allocation9], 32   ;;  %p3311_p3 = pmov %p3308_p4 }
  0xf9   : > { %2307 = vsyncadd (%p3311_p3), [#allocation9], 4294967264  ;;  %p3312_p5 = pmov %p3311_p3 }
  0xfa   : > { %p3313_p7 = pmov %p3311_p3 }
  0xfb   : > { %2309 = dma.done.wait (%p3312_p5), [#allocation12], 1040  }
  0xfc   : > { %2311 = vsyncadd (%p3313_p7), [#allocation12], 4294966256  ;;  %p3314_p6 = pmov %p3311_p3 }
  0xfd   : > { %p3315_p9 = pmov %p3311_p3 }
  0xfe   : > { %2313 = dma.done.wait (%p3314_p6), [#allocation15], 144  }
  0xff   : > { %2315 = vsyncadd (%p3315_p9), [#allocation15], 4294967152  ;;  %v1902_v0 = vld [vmem:[#allocation5] sm:$0xff]   ;;  %v1903_v1 = vld [vmem:[#allocation5 + $0x8] sm:$0xff]   ;;  %vm563_vm0 = vcmask 654336   ;;  %v2347_v63 = vmov 0.0  }
 0x100   : > { %1717 = vmatprep.subr.bf16.mxu0 %v1902_v0  ;;  %v1904_v2 = vld [vmem:[#allocation5 + $0x10] sm:$0xff]   ;;  %v1907_v3 = vld [vmem:[%s2710_s26] sm:$0xff]   ;;  %v1905_v4 = vld [vmem:[#allocation5 + $0x18] sm:$0xff]   ;;  %1743 = vmatprep.subr.bf16.mxu1 %v2347_v63  ;;  %vm2348_vm1 = vmmov 0   ;;  %vm1112_vm2 = vcmask 1040384   ;;  %vm1251_vm3 = vcmask 130048  }
 0x101   : > { %1718 = vmatpush3.bf16.msra.mxu0 %v1902_v0  ;;  %1727 = vmatprep.mubr.msk.bf16.mxu0 %vm563_vm0, %v1907_v3  ;;  %v1906_v5 = vld [vmem:[#allocation5 + $0x20] sm:$0xff]   ;;  %v1908_v6 = vld [vmem:[%s2710_s26 + $0x8] sm:$0xff]   ;;  %v1909_v7 = vld [vmem:[%s2710_s26 + $0x10] sm:$0xff]   ;;  %s1638_s16 = sshll.u32 %s2706_s18, 7  ;;  %s1692_s20 = sshll.u32 %s2423_s15, 11 }
 0x102   : > { %1719 = vmatprep.subr.bf16.mxu0 %v1903_v1  ;;  %v1910_v8 = vld [vmem:[%s2710_s26 + $0x18] sm:$0xff]   ;;  %v1911_v9 = vld [vmem:[%s2710_s26 + $0x20] sm:$0xff]   ;;  %v1912_v10 = vld [vmem:[%s2710_s26 + $0x28] sm:$0xff]   ;;  %1759 = vmatprep.mubr.msk.bf16.mxu1 %vm2348_vm1, %v2347_v63  ;;  %s456_s17 = scalar_lea.vmem [#allocation17], %s1638_s16  ;;  %s3316_s13 = sld [smem:[#allocation25_spill]] }
 0x103   : > { %v1913_v11 = vld [vmem:[%s2710_s26 + $0x30] sm:$0xff]   ;;  %v1914_v12 = vld [vmem:[%s2710_s26 + $0x38] sm:$0xff]   ;;  %v2748_v13 = vld [vmem:[#allocation7] ss:$0 sm:$0xff]  ;;  %s1465_s29 = sshll.u32 %s456_s17, 4  ;;  %s1451_s15 = scalar_lea.sflag [#allocation4], %s2706_s18  ;;  %s3233_s29 = int_to_ptr.vmem [resolvable:$true] %s1465_s29 }
 0x104   : > { %v1915_v62 = vld [vmem:[#allocation11] sm:$0xff]   ;;  %v1916_v0 = vld [vmem:[#allocation11 + $0x8] sm:$0xff]   ;;  %s2252_s1 = scalar_lea.vmem %s3233_s29, 2048  ;;  %p3317_p1 = scmp.ne.s32.totalorder %s3303_s24, 0 }
 0x105   : > { %1720 = vmatpush3.bf16.msra.mxu0 %v1903_v1  ;;  %1744 = vmatpush3.bf16.msra.mxu1 %v1915_v62  ;;  %v1917_v1 = vld [vmem:[#allocation11 + $0x10] sm:$0xff]   ;;  %v1919_v3 = vld [vmem:[#allocation11 + $0x20] sm:$0xff]   ;;  %v2870_v62 = vld [vmem:[#allocation8] ss:$0 sm:$0xff]  ;;  %p2253_p12 = scmp.ne.s32.totalorder %s3233_s29, %s2252_s1  ;;  %s2349_s23 = smov [#allocation17]  }
 0x106   : > { %1721 = vmatprep.subr.bf16.mxu0 %v1904_v2  ;;  %1745 = vmatprep.subr.bf16.mxu1 %v2347_v63  ;;  %s2256_s27 = sshll.u32 %s2349_s23, 4  ;;  %s2257_s27 = int_to_ptr.vmem [resolvable:$false] %s2256_s27 }
 0x107   : > { %p2254_p13 = pnand %p2253_p12, %p3317_p1  ;;  %s2258_s22 = scalar_lea.vmem %s2257_s27, 4096 }
 0x108   : > { %s3231_s28 = scalar_lea.hbm %s3316_s13, %s1692_s20  ;;  %p2259_p2 = scmp.lt.s32.totalorder %s3233_s29, %s2257_s27 }
 0x109   : > { %1722 = vmatpush3.bf16.msra.mxu0 %v1904_v2  ;;  %1746 = vmatpush3.bf16.msra.mxu1 %v1916_v0  ;;  %v1918_v2 = vld [vmem:[#allocation11 + $0x18] sm:$0xff]   ;;  %p2255_p0 = pneg %p2254_p13  ;;  %p2260_p8 = scmp.lt.s32.totalorder %s2258_s22, %s2252_s1 }
 0x10a   : > { %1723 = vmatprep.subr.bf16.mxu0 %v1905_v4  ;;  %1747 = vmatprep.subr.bf16.mxu1 %v2347_v63 }
 0x10b   : > { %p2261_p4 = por %p2260_p8, %p2259_p2 }
 0x10d   : > { %1724 = vmatpush3.bf16.msra.mxu0 %v1905_v4  ;;  %1748 = vmatpush3.bf16.msra.mxu1 %v1917_v1  ;;  %v1920_v4 = vld [vmem:[#allocation11 + $0x28] sm:$0xff]   ;;  %p2262_p10 = pnand %p2261_p4, %p2255_p0 }
 0x10e   : > { %1725 = vmatprep.subr.bf16.mxu0 %v1906_v5  ;;  %1749 = vmatprep.subr.bf16.mxu1 %v2347_v63 }
 0x111   : > { %1726 = vmatpush3.bf16.msra.mxu0 %v1906_v5  ;;  %1750 = vmatpush3.bf16.msra.mxu1 %v1918_v2  ;;  %v1921_v5 = vld [vmem:[#allocation11 + $0x30] sm:$0xff]  }
 0x112   : > { %1751 = vmatprep.subr.bf16.mxu1 %v2347_v63 }
 0x114   : > { %1728 = vmatmul.mubr.msk.bf16.vlgmr.msra.gmra.mrb[0].mxu0 %vm563_vm0, %v1908_v6  ;;  %v1922_v6 = vld [vmem:[#allocation11 + $0x38] sm:$0xff]  }
 0x115   : > { %1731 = vmatprep.mubr.msk.bf16.mxu0 %vm563_vm0, %v1909_v7  ;;  %1752 = vmatpush3.bf16.msra.mxu1 %v1919_v3 }
 0x116   : > { %1753 = vmatprep.subr.bf16.mxu1 %v2347_v63 }
 0x119   : > { %1754 = vmatpush3.bf16.msra.mxu1 %v1920_v4 }
 0x11a   : > { %1755 = vmatprep.subr.bf16.mxu1 %v2347_v63 }
 0x11c   : > { %1732 = vmatmul.mubr.msk.bf16.gmra.mrb[4].mxu0 %vm563_vm0, %v1910_v8 }
 0x11d   : > { %1735 = vmatprep.mubr.msk.bf16.mxu0 %vm563_vm0, %v1911_v9  ;;  %1756 = vmatpush3.bf16.msra.mxu1 %v1921_v5  ;;  %v2875_v5 = vld [vmem:[#allocation10] ss:$0 sm:$0xff] }
 0x11e   : > { %1757 = vmatprep.subr.bf16.mxu1 %v2347_v63 }
 0x121   : > { %1758 = vmatpush3.bf16.msra.mxu1 %v1922_v6 }
 0x122   : > { %1763 = vmatprep.subr.bf16.mxu1 %v2347_v63 }
 0x124   : > { %1736 = vmatmul.mubr.msk.bf16.gmra.mrb[8].mxu0 %vm563_vm0, %v1912_v10 }
 0x125   : > { %1739 = vmatprep.mubr.msk.bf16.mxu0 %vm563_vm0, %v1913_v11 }
 0x12c   : > { %1740 = vmatmul.mubr.msk.bf16.gmra.mrb[12].mxu0 %vm563_vm0, %v1914_v12 }
 0x1e7   : > { %v1729_v14 = vpop.f32.mrb[0].mxu0 }
 0x1e8   : > { %v2751_v15 = vadd.f32 %v1729_v14, %v2748_v13  ;;  %v622_v16 = vpop.f32.mrb[1].mxu0 }
 0x1e9   : > { %v1730_v17 = vpop.f32.mrb[2].mxu0  ;;  %v2758_v20 = vadd.f32 %v2748_v13, %v622_v16 }
 0x1ea   : > { %689 = vadd.xlane.f32.xlu0 %v2751_v15  ;;  %v625_v18 = vpop.f32.mrb[3].mxu0  ;;  %v2764_v23 = vadd.f32 %v1730_v17, %v2748_v13  ;;  %v735_v27 = vmul.f32 %v2751_v15, %v2751_v15 }
 0x1eb   : > { %v2755_v19 = vadd.f32 %v2748_v13, %v625_v18  ;;  %v733_v34 = vmul.f32 %v2758_v20, %v2758_v20 }
 0x1ec   : > { %v736_v37 = vmul.f32 %v2764_v23, %v2764_v23 }
 0x1ed   : > { %v734_v21 = vmul.f32 %v2755_v19, %v2755_v19 }
 0x1ee   : > { %685 = vadd.xlane.f32.xlu0 %v2758_v20 }
 0x1ef   : > { %v1733_v22 = vpop.f32.mrb[4].mxu0  ;;  %751 = vadd.xlane.f32.xlu1 %v734_v21 }
 0x1f0   : > { %v638_v24 = vpop.f32.mrb[5].mxu0  ;;  %v2787_v41 = vadd.f32 %v1733_v22, %v2748_v13 }
 0x1f1   : > { %v1734_v25 = vpop.f32.mrb[6].mxu0  ;;  %v2793_v43 = vadd.f32 %v2748_v13, %v638_v24 }
 0x1f2   : > { %v641_v26 = vpop.f32.mrb[7].mxu0  ;;  %691 = vadd.xlane.f32.xlu0 %v2764_v23  ;;  %v2823_v53 = vadd.f32 %v1734_v25, %v2748_v13  ;;  %v739_v56 = vmul.f32 %v2787_v41, %v2787_v41 }
 0x1f3   : > { %v2801_v45 = vadd.f32 %v2748_v13, %v641_v26  ;;  %v737_v48 = vmul.f32 %v2793_v43, %v2793_v43 }
 0x1f4   : > { %v740_v58 = vmul.f32 %v2823_v53, %v2823_v53 }
 0x1f5   : > { %v738_v50 = vmul.f32 %v2801_v45, %v2801_v45 }
 0x1f6   : > { %753 = vadd.xlane.f32.xlu0 %v735_v27 }
 0x1f7   : > { %v1737_v28 = vpop.f32.mrb[8].mxu0 }
 0x1f8   : > { %v2770_v29 = vadd.f32 %v1737_v28, %v2748_v13  ;;  %v654_v30 = vpop.f32.mrb[9].mxu0 }
 0x1f9   : > { %v1738_v31 = vpop.f32.mrb[10].mxu0  ;;  %v2775_v33 = vadd.f32 %v2748_v13, %v654_v30 }
 0x1fa   : > { %v657_v32 = vpop.f32.mrb[11].mxu0  ;;  %705 = vadd.xlane.f32.xlu1 %v2770_v29  ;;  %687 = vadd.xlane.f32.xlu0 %v2755_v19  ;;  %v2781_v36 = vadd.f32 %v1738_v31, %v2748_v13  ;;  %v743_v42 = vmul.f32 %v2770_v29, %v2770_v29 }
 0x1fb   : > { %v2796_v44 = vadd.f32 %v2748_v13, %v657_v32  ;;  %v741_v52 = vmul.f32 %v2775_v33, %v2775_v33 }
 0x1fc   : > { %v744_v46 = vmul.f32 %v2781_v36, %v2781_v36 }
 0x1fd   : > { %v742_v47 = vmul.f32 %v2796_v44, %v2796_v44 }
 0x1fe   : > { %701 = vadd.xlane.f32.xlu1 %v2775_v33  ;;  %749 = vadd.xlane.f32.xlu0 %v733_v34 }
 0x1ff   : > { %v1741_v35 = vpop.f32.mrb[12].mxu0 }
 0x200   : > { %v670_v38 = vpop.f32.mrb[13].mxu0  ;;  %v2811_v49 = vadd.f32 %v1741_v35, %v2748_v13 }
 0x201   : > { %v1742_v39 = vpop.f32.mrb[14].mxu0  ;;  %v2817_v51 = vadd.f32 %v2748_v13, %v670_v38 }
 0x202   : > { %707 = vadd.xlane.f32.xlu1 %v2781_v36  ;;  %755 = vadd.xlane.f32.xlu0 %v736_v37  ;;  %v673_v40 = vpop.f32.mrb[15].mxu0  ;;  %v2826_v54 = vadd.f32 %v1742_v39, %v2748_v13  ;;  %v747_v55 = vmul.f32 %v2811_v49, %v2811_v49 }
 0x203   : > { %v2835_v57 = vadd.f32 %v2748_v13, %v673_v40  ;;  %v745_v59 = vmul.f32 %v2817_v51, %v2817_v51 }
 0x204   : > { %v748_v61 = vmul.f32 %v2826_v54, %v2826_v54 }
 0x205   : > { %v746_v60 = vmul.f32 %v2835_v57, %v2835_v57 }
 0x206   : > { %769 = vadd.xlane.f32.xlu1 %v743_v42  ;;  %697 = vadd.xlane.f32.xlu0 %v2787_v41 }
 0x20a   : > { %703 = vadd.xlane.f32.xlu1 %v2796_v44  ;;  %693 = vadd.xlane.f32.xlu0 %v2793_v43 }
 0x20e   : > { %771 = vadd.xlane.f32.xlu1 %v744_v46  ;;  %695 = vadd.xlane.f32.xlu0 %v2801_v45 }
 0x212   : > { %767 = vadd.xlane.f32.xlu1 %v742_v47  ;;  %757 = vadd.xlane.f32.xlu0 %v737_v48 }
 0x216   : > { %713 = vadd.xlane.f32.xlu1 %v2811_v49  ;;  %759 = vadd.xlane.f32.xlu0 %v738_v50 }
 0x21a   : > { %709 = vadd.xlane.f32.xlu1 %v2817_v51  ;;  %765 = vadd.xlane.f32.xlu0 %v741_v52 }
 0x21e   : > { %715 = vadd.xlane.f32.xlu1 %v2826_v54  ;;  %699 = vadd.xlane.f32.xlu0 %v2823_v53 }
 0x222   : > { %777 = vadd.xlane.f32.xlu1 %v747_v55  ;;  %761 = vadd.xlane.f32.xlu0 %v739_v56 }
 0x226   : > { %711 = vadd.xlane.f32.xlu1 %v2835_v57  ;;  %763 = vadd.xlane.f32.xlu0 %v740_v58 }
 0x22a   : > { %773 = vadd.xlane.f32.xlu1 %v745_v59 }
 0x22e   : > { %775 = vadd.xlane.f32.xlu1 %v746_v60 }
 0x232   : > { %779 = vadd.xlane.f32.xlu1 %v748_v61 }
 0x277   : > { %v690_v7 = vpop.xlane.xlu0 %689 }
 0x278   : > { %v719_v10 = vmul.f32 0.03125, %v690_v7 }
 0x27a   : > { %v799_v13 = vmul.f32 %v719_v10, %v719_v10  ;;  %v831_v50 = vsub.f32 %v2751_v15, %v719_v10 }
 0x27b   : > { %v686_v8 = vpop.xlane.xlu0 %685 }
 0x27c   : > { %v752_v11 = vpop.xlane.xlu1 %751  ;;  %v717_v21 = vmul.f32 0.03125, %v686_v8 }
 0x27d   : > { %v782_v25 = vmul.f32 0.03125, %v752_v11 }
 0x27e   : > { %v797_v30 = vmul.f32 %v717_v21, %v717_v21  ;;  %v829_v6 = vsub.f32 %v2758_v20, %v717_v21 }
 0x27f   : > { %v692_v9 = vpop.xlane.xlu0 %691 }
 0x280   : > { %v2859_v31 = vmul.f32 0.03125, %v692_v9 }
 0x282   : > { %v800_v40 = vmul.f32 %v2859_v31, %v2859_v31 }
 0x283   : > { %v754_v12 = vpop.xlane.xlu0 %753 }
 0x284   : > { %v783_v14 = vmul.f32 0.03125, %v754_v12 }
 0x286   : > { %v815_v16 = vsub.f32 %v783_v14, %v799_v13 }
 0x287   : > { %v706_v17 = vpop.xlane.xlu1 %705  ;;  %v688_v18 = vpop.xlane.xlu0 %687 }
 0x288   : > { %v847_v22 = vadd.f32 1e-05, %v815_v16  ;;  %v718_v24 = vmul.f32 0.03125, %v688_v18  ;;  %v2863_v47 = vmul.f32 0.03125, %v706_v17 }
 0x28a   : > { %1924 = vrsqrt.f32 %v847_v22  ;;  %v798_v26 = vmul.f32 %v718_v24, %v718_v24  ;;  %v807_v60 = vmul.f32 %v2863_v47, %v2863_v47  ;;  %v830_v7 = vsub.f32 %v2755_v19, %v718_v24 }
 0x28b   : > { %v2857_v27 = vpop.xlane.xlu1 %701  ;;  %v750_v28 = vpop.xlane.xlu0 %749 }
 0x28c   : > { %v814_v32 = vsub.f32 %v782_v25, %v798_v26  ;;  %v781_v34 = vmul.f32 0.03125, %v750_v28 }
 0x28e   : > { %v846_v35 = vadd.f32 1e-05, %v814_v32  ;;  %v813_v37 = vsub.f32 %v781_v34, %v797_v30 }
 0x28f   : > { %v708_v38 = vpop.xlane.xlu1 %707  ;;  %v756_v39 = vpop.xlane.xlu0 %755 }
 0x290   : > { %1926 = vrsqrt.f32 %v846_v35  ;;  %v845_v42 = vadd.f32 1e-05, %v813_v37  ;;  %v784_v46 = vmul.f32 0.03125, %v756_v39  ;;  %v2872_v3 = vmul.f32 0.03125, %v708_v38 }
 0x292   : > { %1928 = vrsqrt.f32 %v845_v42  ;;  %v816_v48 = vsub.f32 %v784_v46, %v800_v40  ;;  %v808_v13 = vmul.f32 %v2872_v3, %v2872_v3  ;;  %v832_v42 = vsub.f32 %v2764_v23, %v2859_v31 }
 0x293   : > { %v770_v52 = vpop.xlane.xlu1 %769  ;;  %v2866_v55 = vpop.xlane.xlu0 %697 }
 0x294   : > { %v1925_v56 = vpop.eup %1924  ;;  %v791_v58 = vmul.f32 0.03125, %v770_v52  ;;  %v848_v61 = vadd.f32 1e-05, %v816_v48 }
 0x295   : > { %v879_v59 = vmul.f32 %v1925_v56, %v831_v50  ;;  %v2900_v50 = vmul.f32 0.03125, %v2857_v27 }
 0x296   : > { %v823_v0 = vsub.f32 %v791_v58, %v807_v60  ;;  %1930 = vrsqrt.f32 %v848_v61 }
 0x297   : > { %v704_v1 = vpop.xlane.xlu1 %703  ;;  %v694_v2 = vpop.xlane.xlu0 %693  ;;  %v902_v4 = vmul.f32 %v2870_v62, %v879_v59 }
 0x298   : > { %v855_v8 = vadd.f32 1e-05, %v823_v0  ;;  %v2879_v9 = vmul.f32 0.03125, %v704_v1  ;;  %v2883_v14 = vmul.f32 0.03125, %v694_v2 }
 0x299   : > { %v2886_v17 = vadd.f32 %v2875_v5, %v902_v4 }
 0x29a   : > { %v1927_v15 = vpop.eup %1926  ;;  %1932 = vrsqrt.f32 %v855_v8  ;;  %v806_v19 = vmul.f32 %v2879_v9, %v2879_v9  ;;  %v801_v26 = vmul.f32 %v2883_v14, %v2883_v14  ;;  %v805_v8 = vmul.f32 %v2900_v50, %v2900_v50 }
 0x29b   : > { %v772_v10 = vpop.xlane.xlu1 %771  ;;  %v696_v11 = vpop.xlane.xlu0 %695  ;;  %v878_v18 = vmul.f32 %v1927_v15, %v830_v7  ;;  %v957_v32 = vmul.f32 0.044715, %v2886_v17 }
 0x29c   : > { %v1929_v12 = vpop.eup %1928  ;;  %v792_v16 = vmul.f32 0.03125, %v772_v10  ;;  %v2895_v37 = vmul.f32 0.03125, %v696_v11  ;;  %v2918_v11 = vmul.f32 0.03125, %v2866_v55 }
 0x29d   : > { %v877_v22 = vmul.f32 %v1929_v12, %v829_v6  ;;  %v901_v34 = vmul.f32 %v2870_v62, %v878_v18  ;;  %v973_v59 = vmul.f32 %v957_v32, %v2886_v17  ;;  %v833_v32 = vsub.f32 %v2793_v43, %v2883_v14 }
 0x29e   : > { %v824_v20 = vsub.f32 %v792_v16, %v808_v13  ;;  %v802_v23 = vmul.f32 %v2895_v37, %v2895_v37  ;;  %v839_v13 = vsub.f32 %v2770_v29, %v2863_v47  ;;  %v837_v16 = vsub.f32 %v2775_v33, %v2900_v50 }
 0x29f   : > { %v768_v21 = vpop.xlane.xlu1 %767  ;;  %v758_v24 = vpop.xlane.xlu0 %757  ;;  %v900_v25 = vmul.f32 %v2870_v62, %v877_v22  ;;  %v2907_v60 = vadd.f32 %v2875_v5, %v901_v34  ;;  %v989_v6 = vmul.f32 %v973_v59, %v2886_v17  ;;  %v834_v34 = vsub.f32 %v2801_v45, %v2895_v37 }
 0x2a0   : > { %v790_v28 = vmul.f32 0.03125, %v768_v21  ;;  %v785_v30 = vmul.f32 0.03125, %v758_v24  ;;  %v856_v35 = vadd.f32 1e-05, %v824_v20  ;;  %v1931_v40 = vpop.eup %1930  ;;  %v840_v21 = vsub.f32 %v2781_v36, %v2872_v3 }
 0x2a1   : > { %v2903_v52 = vadd.f32 %v2875_v5, %v900_v25  ;;  %v880_v0 = vmul.f32 %v1931_v40, %v832_v42  ;;  %v956_v7 = vmul.f32 0.044715, %v2907_v60  ;;  %v1005_v55 = vadd.f32 %v989_v6, %v2886_v17 }
 0x2a2   : > { %v822_v38 = vsub.f32 %v790_v28, %v806_v19  ;;  %v817_v39 = vsub.f32 %v785_v30, %v801_v26  ;;  %1934 = vrsqrt.f32 %v856_v35  ;;  %v803_v28 = vmul.f32 %v2918_v11, %v2918_v11 }
 0x2a3   : > { %v714_v46 = vpop.xlane.xlu1 %713  ;;  %v760_v48 = vpop.xlane.xlu0 %759  ;;  %v955_v1 = vmul.f32 0.044715, %v2903_v52  ;;  %v903_v10 = vmul.f32 %v2870_v62, %v880_v0  ;;  %v972_v25 = vmul.f32 %v956_v7, %v2907_v60  ;;  %v835_v30 = vsub.f32 %v2787_v41, %v2918_v11 }
 0x2a4   : > { %v854_v56 = vadd.f32 1e-05, %v822_v38  ;;  %v849_v58 = vadd.f32 1e-05, %v817_v39  ;;  %v786_v61 = vmul.f32 0.03125, %v760_v48  ;;  %v1933_v15 = vpop.eup %1932  ;;  %v2929_v24 = vmul.f32 0.03125, %v714_v46 }
 0x2a5   : > { %v971_v19 = vmul.f32 %v955_v1, %v2903_v52  ;;  %v887_v29 = vmul.f32 %v1933_v15, %v839_v13  ;;  %v2934_v26 = vadd.f32 %v2875_v5, %v903_v10  ;;  %v838_v36 = vsub.f32 %v2796_v44, %v2879_v9 }
 0x2a6   : > { %1936 = vrsqrt.f32 %v854_v56  ;;  %v818_v2 = vsub.f32 %v786_v61, %v802_v23  ;;  %v2947_v39 = vmul.f32 0.5, %v2886_v17  ;;  %v811_v46 = vmul.f32 %v2929_v24, %v2929_v24 }
 0x2a7   : > { %1938 = vrsqrt.f32 %v849_v58  ;;  %v710_v27 = vpop.xlane.xlu1 %709  ;;  %v766_v31 = vpop.xlane.xlu0 %765  ;;  %v987_v42 = vmul.f32 %v971_v19, %v2903_v52  ;;  %v2952_v56 = vmul.f32 0.7978846, %v1005_v55  ;;  %v988_v43 = vmul.f32 %v972_v25, %v2907_v60 }
 0x2a8   : > { %v789_v4 = vmul.f32 0.03125, %v766_v31  ;;  %v850_v12 = vadd.f32 1e-05, %v818_v2  ;;  %v910_v45 = vmul.f32 %v2870_v62, %v887_v29  ;;  %v958_v37 = vmul.f32 0.044715, %v2934_v26 }
 0x2a9   : > { %v2958_v23 = vmul.f32 0.03125, %v710_v27 }
 0x2aa   : > { %v821_v18 = vsub.f32 %v789_v4, %v805_v8  ;;  %1940 = vrsqrt.f32 %v850_v12  ;;  %v1003_v4 = vadd.f32 %v987_v42, %v2903_v52  ;;  %v1004_v8 = vadd.f32 %v988_v43, %v2907_v60 }
 0x2ab   : > { %v2924_v22 = vpop.xlane.xlu1 %715  ;;  %v700_v20 = vpop.xlane.xlu0 %699  ;;  %v843_v12 = vsub.f32 %v2811_v49, %v2929_v24  ;;  %v809_v25 = vmul.f32 %v2958_v23, %v2958_v23 }
 0x2ac   : > { %v853_v47 = vadd.f32 1e-05, %v821_v18  ;;  %v1935_v3 = vpop.eup %1934  ;;  %v2960_v31 = vmul.f32 0.03125, %v700_v20  ;;  %v974_v18 = vmul.f32 %v958_v37, %v2934_v26  ;;  %v2972_v20 = vadd.f32 %v2875_v5, %v910_v45 }
 0x2ad   : > { %v888_v61 = vmul.f32 %v1935_v3, %v840_v21  ;;  %v1019_v29 = vmul.f32 0.7978846, %v1003_v4 }
 0x2ae   : > { %1942 = vrsqrt.f32 %v853_v47  ;;  %v804_v49 = vmul.f32 %v2960_v31, %v2960_v31  ;;  %v836_v41 = vsub.f32 %v2823_v53, %v2960_v31 }
 0x2af   : > { %v778_v35 = vpop.xlane.xlu1 %777  ;;  %v762_v38 = vpop.xlane.xlu0 %761  ;;  %v911_v21 = vmul.f32 %v2870_v62, %v888_v61 }
 0x2b0   : > { %v1937_v40 = vpop.eup %1936  ;;  %v795_v44 = vmul.f32 0.03125, %v778_v35  ;;  %v787_v9 = vmul.f32 0.03125, %v762_v38  ;;  %v990_v38 = vmul.f32 %v974_v18, %v2934_v26 }
 0x2b1   : > { %v1939_v48 = vpop.eup %1938  ;;  %v886_v14 = vmul.f32 %v1937_v40, %v838_v36  ;;  %v965_v40 = vmul.f32 0.044715, %v2972_v20 }
 0x2b2   : > { %v881_v17 = vmul.f32 %v1939_v48, %v833_v32  ;;  %v827_v58 = vsub.f32 %v795_v44, %v811_v46  ;;  %v819_v59 = vsub.f32 %v787_v9, %v803_v28  ;;  %v2993_v46 = vmul.f32 0.03125, %v2924_v22 }
 0x2b3   : > { %v909_v0 = vmul.f32 %v2870_v62, %v886_v14  ;;  %v712_v1 = vpop.xlane.xlu1 %711  ;;  %v764_v2 = vpop.xlane.xlu0 %763  ;;  %v2996_v44 = vadd.f32 %v2875_v5, %v911_v21 }
 0x2b4   : > { %v904_v15 = vmul.f32 %v2870_v62, %v881_v17  ;;  %v859_v6 = vadd.f32 1e-05, %v827_v58  ;;  %v851_v7 = vadd.f32 1e-05, %v819_v59  ;;  %v788_v27 = vmul.f32 0.03125, %v764_v2  ;;  %v1941_v13 = vpop.eup %1940 }
 0x2b5   : > { %v2966_v10 = vadd.f32 %v2875_v5, %v909_v0  ;;  %v882_v55 = vmul.f32 %v1941_v13, %v834_v34  ;;  %v2983_v28 = vmul.f32 0.03125, %v712_v1  ;;  %v1020_v58 = vmul.f32 0.7978846, %v1004_v8 }
 0x2b6   : > { %v2975_v19 = vadd.f32 %v2875_v5, %v904_v15  ;;  %1944 = vrsqrt.f32 %v859_v6  ;;  %v820_v35 = vsub.f32 %v788_v27, %v804_v49  ;;  %v981_v59 = vmul.f32 %v965_v40, %v2972_v20 }
 0x2b7   : > { %v774_v24 = vpop.xlane.xlu1 %773  ;;  %1946 = vrsqrt.f32 %v851_v7  ;;  %v964_v3 = vmul.f32 0.044715, %v2966_v10  ;;  %v905_v32 = vmul.f32 %v2870_v62, %v882_v55  ;;  %v810_v33 = vmul.f32 %v2983_v28, %v2983_v28 }
 0x2b8   : > { %v959_v47 = vmul.f32 0.044715, %v2975_v19  ;;  %v1943_v36 = vpop.eup %1942  ;;  %v793_v34 = vmul.f32 0.03125, %v774_v24  ;;  %v852_v48 = vadd.f32 1e-05, %v820_v35  ;;  %v812_v2 = vmul.f32 %v2993_v46, %v2993_v46 }
 0x2b9   : > { %v885_v42 = vmul.f32 %v1943_v36, %v837_v16  ;;  %v2999_v9 = vadd.f32 %v2875_v5, %v905_v32  ;;  %v980_v16 = vmul.f32 %v964_v3, %v2966_v10  ;;  %v966_v1 = vmul.f32 0.044715, %v2996_v44 }
 0x2ba   : > { %v825_v43 = vsub.f32 %v793_v34, %v809_v25  ;;  %v975_v14 = vmul.f32 %v959_v47, %v2975_v19  ;;  %1948 = vrsqrt.f32 %v852_v48  ;;  %v1006_v55 = vadd.f32 %v990_v38, %v2934_v26 }
 0x2bb   : > { %v776_v45 = vpop.xlane.xlu1 %775  ;;  %v908_v37 = vmul.f32 %v2870_v62, %v885_v42  ;;  %v960_v22 = vmul.f32 0.044715, %v2999_v9  ;;  %v996_v18 = vmul.f32 %v980_v16, %v2966_v10  ;;  %v997_v36 = vmul.f32 %v981_v59, %v2972_v20 }
 0x2bc   : > { %v794_v50 = vmul.f32 0.03125, %v776_v45  ;;  %v857_v17 = vadd.f32 1e-05, %v825_v43  ;;  %v991_v13 = vmul.f32 %v975_v14, %v2975_v19  ;;  %v1022_v48 = vmul.f32 0.7978846, %v1006_v55 }
 0x2bd   : > { %v3009_v61 = vadd.f32 %v2875_v5, %v908_v37  ;;  %v976_v15 = vmul.f32 %v960_v22, %v2999_v9  ;;  %v1012_v38 = vadd.f32 %v996_v18, %v2966_v10  ;;  %v841_v45 = vsub.f32 %v2817_v51, %v2958_v23 }
 0x2be   : > { %v826_v0 = vsub.f32 %v794_v50, %v810_v33  ;;  %1950 = vrsqrt.f32 %v857_v17  ;;  %v1007_v34 = vadd.f32 %v991_v13, %v2975_v19  ;;  %v1013_v31 = vadd.f32 %v997_v36, %v2972_v20 }
 0x2bf   : > { %v780_v4 = vpop.xlane.xlu1 %779  ;;  %v963_v7 = vmul.f32 0.044715, %v3009_v61  ;;  %1952 = vtanh.f32 %v1019_v29  ;;  %v992_v47 = vmul.f32 %v976_v15, %v2999_v9  ;;  %v1028_v17 = vmul.f32 0.7978846, %v1012_v38 }
 0x2c0   : > { %v1945_v6 = vpop.eup %1944  ;;  %v858_v27 = vadd.f32 1e-05, %v826_v0  ;;  %v796_v8 = vmul.f32 0.03125, %v780_v4  ;;  %v1023_v22 = vmul.f32 0.7978846, %v1007_v34  ;;  %v939_v51 = vmul.f32 0.5, %v2903_v52 }
 0x2c1   : > { %v891_v21 = vmul.f32 %v1945_v6, %v843_v12  ;;  %v1947_v25 = vpop.eup %1946  ;;  %v979_v49 = vmul.f32 %v963_v7, %v3009_v61  ;;  %v982_v12 = vmul.f32 %v966_v1, %v2996_v44  ;;  %v1008_v11 = vadd.f32 %v992_v47, %v2999_v9 }
 0x2c2   : > { %1954 = vrsqrt.f32 %v858_v27  ;;  %v828_v24 = vsub.f32 %v796_v8, %v812_v2  ;;  %v883_v29 = vmul.f32 %v1947_v25, %v835_v30  ;;  %v1029_v8 = vmul.f32 0.7978846, %v1013_v31 }
 0x2c3   : > { %1956 = vtanh.f32 %v1020_v58  ;;  %v914_v3 = vmul.f32 %v2870_v62, %v891_v21  ;;  %v995_v32 = vmul.f32 %v979_v49, %v3009_v61  ;;  %v998_v33 = vmul.f32 %v982_v12, %v2996_v44 }
 0x2c4   : > { %v860_v35 = vadd.f32 1e-05, %v828_v24  ;;  %v906_v42 = vmul.f32 %v2870_v62, %v883_v29  ;;  %v1949_v30 = vpop.eup %1948  ;;  %v1024_v0 = vmul.f32 0.7978846, %v1008_v11  ;;  %v844_v55 = vsub.f32 %v2826_v54, %v2993_v46 }
 0x2c5   : > { %v3031_v40 = vadd.f32 %v2875_v5, %v914_v3  ;;  %v1011_v43 = vadd.f32 %v995_v32, %v3009_v61  ;;  %v884_v16 = vmul.f32 %v1949_v30, %v836_v41  ;;  %v1014_v52 = vadd.f32 %v998_v33, %v2996_v44 }
 0x2c6   : > { %1958 = vrsqrt.f32 %v860_v35  ;;  %v3041_v14 = vadd.f32 %v2875_v5, %v906_v42  ;;  %v940_v54 = vmul.f32 0.5, %v2907_v60 }
 0x2c7   : > { %v969_v37 = vmul.f32 0.044715, %v3031_v40  ;;  %1960 = vtanh.f32 %v2952_v56  ;;  %v1027_v50 = vmul.f32 0.7978846, %v1011_v43  ;;  %v907_v23 = vmul.f32 %v2870_v62, %v884_v16 }
 0x2c8   : > { %v1951_v53 = vpop.eup %1950  ;;  %v961_v58 = vmul.f32 0.044715, %v3041_v14  ;;  %1962 = vtanh.f32 %v1022_v48  ;;  %v842_v56 = vsub.f32 %v2835_v57, %v2983_v28  ;;  %v1030_v12 = vmul.f32 0.7978846, %v1014_v52 }
 0x2c9   : > { %v889_v59 = vmul.f32 %v1951_v53, %v841_v45  ;;  %v1953_v1 = vpop.eup %1952  ;;  %1964 = vtanh.f32 %v1027_v50  ;;  %v985_v4 = vmul.f32 %v969_v37, %v3031_v40  ;;  %v3055_v6 = vadd.f32 %v2875_v5, %v907_v23 }
 0x2ca   : > { %v977_v2 = vmul.f32 %v961_v58, %v3041_v14  ;;  %1966 = vtanh.f32 %v1023_v22  ;;  %v1051_v21 = vadd.f32 1.0, %v1953_v1  ;;  %v942_v22 = vmul.f32 0.5, %v2934_v26 }
 0x2cb   : > { %v912_v7 = vmul.f32 %v2870_v62, %v889_v59  ;;  %1968 = vtanh.f32 %v1028_v17  ;;  %v962_v28 = vmul.f32 0.044715, %v3055_v6  ;;  %v1001_v49 = vmul.f32 %v985_v4, %v3031_v40 }
 0x2cc   : > { %v1955_v15 = vpop.eup %1954  ;;  %v993_v18 = vmul.f32 %v977_v2, %v3041_v14  ;;  %1970 = vtanh.f32 %v1024_v0  ;;  %v3077_v48 = vmul.f32 %v1051_v21, %v939_v51  ;;  %v943_v59 = vmul.f32 0.5, %v2975_v19 }
 0x2cd   : > { %v1957_v27 = vpop.eup %1956  ;;  %v890_v13 = vmul.f32 %v1955_v15, %v842_v56  ;;  %v3061_v57 = vadd.f32 %v2875_v5, %v912_v7  ;;  %v978_v29 = vmul.f32 %v962_v28, %v3055_v6  ;;  %1972 = vtanh.f32 %v1029_v8 }
 0x2ce   : > { %v1009_v24 = vadd.f32 %v993_v18, %v3041_v14  ;;  %v1052_v36 = vadd.f32 1.0, %v1957_v27  ;;  %v1017_v30 = vadd.f32 %v1001_v49, %v3031_v40  ;;  %v947_v15 = vmul.f32 0.5, %v3009_v61 }
 0x2cf   : > { %v913_v25 = vmul.f32 %v2870_v62, %v890_v13  ;;  %v967_v3 = vmul.f32 0.044715, %v3061_v57  ;;  %v994_v42 = vmul.f32 %v978_v29, %v3055_v6  ;;  %v944_v49 = vmul.f32 0.5, %v2999_v9 }
 0x2d0   : > { %v1959_v47 = vpop.eup %1958  ;;  %v1025_v38 = vmul.f32 0.7978846, %v1009_v24  ;;  %v3082_v45 = vmul.f32 %v1052_v36, %v940_v54  ;;  %v1033_v1 = vmul.f32 0.7978846, %v1017_v30  ;;  %v949_v54 = vmul.f32 0.5, %v2972_v20 }
 0x2d1   : > { %v1961_v32 = vpop.eup %1960  ;;  %v3072_v35 = vadd.f32 %v2875_v5, %v913_v25  ;;  %v892_v34 = vmul.f32 %v1959_v47, %v844_v55  ;;  %v983_v46 = vmul.f32 %v967_v3, %v3061_v57  ;;  %v1010_v60 = vadd.f32 %v994_v42, %v3055_v6 }
 0x2d2   : > { %v1963_v43 = vpop.eup %1962  ;;  %1974 = vtanh.f32 %v1025_v38  ;;  %v1053_v33 = vadd.f32 1.0, %v1961_v32  ;;  %v1083_v51 = vadd.f32 %v3082_v45, %v3077_v48  ;;  %v948_v55 = vmul.f32 0.5, %v2966_v10 }
 0x2d3   : > { %v968_v41 = vmul.f32 0.044715, %v3072_v35  ;;  %v915_v11 = vmul.f32 %v2870_v62, %v892_v34  ;;  %v999_v37 = vmul.f32 %v983_v46, %v3061_v57  ;;  %v1965_v50 = vpop.eup %1964  ;;  %1976 = vtanh.f32 %v1030_v12 }
 0x2d4   : > { %v1967_v62 = vpop.eup %1966  ;;  %v1026_v17 = vmul.f32 0.7978846, %v1010_v60  ;;  %v1054_v58 = vadd.f32 1.0, %v1963_v43  ;;  %v1059_v2 = vadd.f32 1.0, %v1965_v50  ;;  %v3098_v4 = vmul.f32 %v1053_v33, %v2947_v39 }
 0x2d5   : > { %v3087_v16 = vadd.f32 %v2875_v5, %v915_v11  ;;  %v984_v53 = vmul.f32 %v968_v41, %v3072_v35  ;;  %v1015_v31 = vadd.f32 %v999_v37, %v3061_v57  ;;  %v1969_v23 = vpop.eup %1968  ;;  %v1055_v27 = vadd.f32 1.0, %v1967_v62 }
 0x2d6   : > { %v1971_v26 = vpop.eup %1970  ;;  %1978 = vtanh.f32 %v1026_v17  ;;  %v1060_v19 = vadd.f32 1.0, %v1969_v23  ;;  %v3103_v8 = vmul.f32 %v1054_v58, %v942_v22  ;;  %v1084_v13 = vadd.f32 %v1083_v51, %v3098_v4 }
 0x2d7   : > { %v970_v0 = vmul.f32 0.044715, %v3087_v16  ;;  %v1000_v5 = vmul.f32 %v984_v53, %v3072_v35  ;;  %v1031_v56 = vmul.f32 0.7978846, %v1015_v31  ;;  %v1973_v18 = vpop.eup %1972  ;;  %v1056_v39 = vadd.f32 1.0, %v1971_v26 }
 0x2d8   : > { %v3108_v61 = vmul.f32 %v1059_v2, %v947_v15  ;;  %v3112_v47 = vmul.f32 %v1055_v27, %v943_v59  ;;  %v1061_v3 = vadd.f32 1.0, %v1973_v18  ;;  %v3114_v29 = vmul.f32 %v1060_v19, %v948_v55 }
 0x2d9   : > { %v986_v7 = vmul.f32 %v970_v0, %v3087_v16  ;;  %v1016_v52 = vadd.f32 %v1000_v5, %v3072_v35  ;;  %1980 = vtanh.f32 %v1031_v56  ;;  %v945_v32 = vmul.f32 0.5, %v3041_v14 }
 0x2da   : > { %1982 = vtanh.f32 %v1033_v1  ;;  %v3117_v38 = vmul.f32 %v1056_v39, %v944_v49  ;;  %v1085_v10 = vadd.f32 %v1084_v13, %v3103_v8  ;;  %v1098_v9 = vadd.f32 %v3114_v29, %v3108_v61 }
 0x2db   : > { %v1002_v28 = vmul.f32 %v986_v7, %v3087_v16  ;;  %v1032_v21 = vmul.f32 0.7978846, %v1016_v52  ;;  %v3126_v11 = vmul.f32 %v1061_v3, %v949_v54  ;;  %v946_v14 = vmul.f32 0.5, %v3055_v6 }
 0x2dc   : > { %v1975_v25 = vpop.eup %1974  ;;  %v1086_v42 = vadd.f32 %v1085_v10, %v3112_v47  ;;  %v950_v20 = vmul.f32 0.5, %v2996_v44  ;;  %v951_v22 = vmul.f32 0.5, %v3061_v57  ;;  %v952_v23 = vmul.f32 0.5, %v3072_v35  ;;  %v1663_v10 = vld [vmem:[#allocation13] ss:$0 sm:$0xff] }
 0x2dd   : > { %v1018_v24 = vadd.f32 %v1002_v28, %v3087_v16  ;;  %1984 = vtanh.f32 %v1032_v21  ;;  %v1057_v36 = vadd.f32 1.0, %v1975_v25  ;;  %v1977_v12 = vpop.eup %1976  ;;  %v1099_v33 = vadd.f32 %v1098_v9, %v3126_v11 }
 0x2de   : > { %v1062_v41 = vadd.f32 1.0, %v1977_v12  ;;  %v1087_v37 = vadd.f32 %v1086_v42, %v3117_v38  ;;  %v953_v57 = vmul.f32 0.5, %v3031_v40  ;;  %v954_v15 = vmul.f32 0.5, %v3087_v16 }
 0x2df   : > { %v1034_v34 = vmul.f32 0.7978846, %v1018_v24  ;;  %v3123_v46 = vmul.f32 %v1057_v36, %v945_v32 }
 0x2e0   : > { %v1979_v43 = vpop.eup %1978  ;;  %v3136_v17 = vmul.f32 %v1062_v41, %v950_v20 }
 0x2e1   : > { %1986 = vtanh.f32 %v1034_v34  ;;  %v1058_v30 = vadd.f32 1.0, %v1979_v43  ;;  %v1088_v31 = vadd.f32 %v1087_v37, %v3123_v46  ;;  %v1923_v34 = vld [vmem:[#allocation14] sm:$0xff]  }
 0x2e2   : > { %v1100_v0 = vadd.f32 %v1099_v33, %v3136_v17 }
 0x2e3   : > { %v1981_v60 = vpop.eup %1980  ;;  %v3133_v62 = vmul.f32 %v1058_v30, %v946_v14 }
 0x2e4   : > { %v1983_v50 = vpop.eup %1982  ;;  %v1063_v53 = vadd.f32 1.0, %v1981_v60 }
 0x2e5   : > { %v1089_v51 = vadd.f32 %v1088_v31, %v3133_v62  ;;  %v1065_v59 = vadd.f32 1.0, %v1983_v50  ;;  %v1672_v31 = vld [vmem:[#allocation16] ss:$0 sm:$0xff] }
 0x2e6   : > { %v3138_v6 = vmul.f32 %v1063_v53, %v951_v22 }
 0x2e7   : > { %v1985_v58 = vpop.eup %1984  ;;  %v1090_v5 = vrot.slane %v1089_v51, 4  ;;  %v3148_v52 = vmul.f32 %v1065_v59, %v953_v57 }
 0x2e8   : > { %v1064_v44 = vadd.f32 1.0, %v1985_v58  ;;  %v1101_v26 = vadd.f32 %v1100_v0, %v3138_v6 }
 0x2e9   : > { %v1091_v2 = vadd.f32 %v1090_v5, %v1089_v51 }
 0x2ea   : > { %v3144_v1 = vmul.f32 %v1064_v44, %v952_v23 }
 0x2eb   : > { %v1987_v56 = vpop.eup %1986  ;;  %v1092_v19 = vrot.slane %v1091_v2, 2 }
 0x2ec   : > { %v1066_v7 = vadd.f32 1.0, %v1987_v56  ;;  %v1102_v35 = vadd.f32 %v1101_v26, %v3144_v1  ;;  %v1301_v26 = vlaneseq }
 0x2ed   : > { %v1093_v18 = vadd.f32 %v1092_v19, %v1091_v2 }
 0x2ee   : > { %v3151_v27 = vmul.f32 %v1066_v7, %v954_v15  ;;  %v1103_v13 = vadd.f32 %v1102_v35, %v3148_v52  ;;  %v1302_v56 = vshrl.u32 %v1301_v26, 7 }
 0x2ef   : > { %v1094_v39 = vrot.slane %v1093_v18, 1 }
 0x2f0   : > { %v1104_v40 = vadd.f32 %v1103_v13, %v3151_v27  ;;  %v1303_v2 = vsub.s32 0, %v1302_v56  ;;  %v1377_v15 = vsub.s32 1, %v1302_v56 }
 0x2f1   : > { %v1095_v49 = vadd.f32 %v1094_v39, %v1093_v18 }
 0x2f2   : > { %v1105_v28 = vrot.slane %v1104_v40, 4 }
 0x2f3   : > { %v1097_v36 = vmul.f32 0.015625, %v1095_v49 }
 0x2f4   : > { %v1106_v21 = vadd.f32 %v1105_v28, %v1104_v40 }
 0x2f6   : > { %v1107_v55 = vrot.slane %v1106_v21, 2 }
 0x2f8   : > { %v1108_v25 = vadd.f32 %v1107_v55, %v1106_v21 }
 0x2fa   : > { %v1109_v16 = vrot.slane %v1108_v25, 1 }
 0x2fc   : > { %v1110_v24 = vadd.f32 %v1109_v16, %v1108_v25 }
 0x2fe   : > { %v1111_v3 = vmul.f32 0.015625, %v1110_v24 }
 0x300   : > { %v1113_v12 = vsel %vm1112_vm2, %v1097_v36, %v1111_v3 }
 0x301   : > { %v1114_v32 = vpack.c.bf16 %v1113_v12, %v1113_v12 }
 0x303   : > { %1760 = vmatmul.mubr.bf16.vlgmr.msra.gmra.mrb[0].mxu1 %v1114_v32 }
 0x304   : > { %1765 = vmatprep.mubr.msk.bf16.mxu1 %vm2348_vm1, %v2347_v63  ;;  %1764 = vmatpush3.bf16.msra.mxu1 %v1923_v34 }
 0x3d6   : > { %v1220_v54 = vpop.f32.mrb[0].mxu1 }
 0x3d7   : > { %v1221_v9 = vadd.f32 %v1663_v10, %v1220_v54  ;;  %v1761_v42 = vpop.f32.mrb[1].mxu1 }
 0x3d8   : > { %v1223_v43 = vpop.f32.mrb[2].mxu1 }
 0x3d9   : > { %v1227_v41 = vmul.f32 0.044715, %v1221_v9  ;;  %v1762_v14 = vpop.f32.mrb[3].mxu1  ;;  %v1226_v50 = vmul.f32 0.5, %v1221_v9 }
 0x3db   : > { %v1228_v30 = vmul.f32 %v1227_v41, %v1221_v9 }
 0x3dd   : > { %v1229_v37 = vmul.f32 %v1228_v30, %v1221_v9 }
 0x3df   : > { %v1230_v60 = vadd.f32 %v1229_v37, %v1221_v9 }
 0x3e1   : > { %v1231_v20 = vmul.f32 0.7978846, %v1230_v60 }
 0x3e3   : > { %1988 = vtanh.f32 %v1231_v20 }
 0x3ed   : > { %v1989_v33 = vpop.eup %1988 }
 0x3ee   : > { %v1233_v22 = vadd.f32 1.0, %v1989_v33 }
 0x3f0   : > { %v1234_v53 = vmul.f32 %v1233_v22, %v1226_v50 }
 0x3f2   : > { %v1235_v63 = vpack.c.bf16 %v1234_v53, %v1234_v53 }
 0x3f4   : > { %1766 = vmatmul.mubr.msk.bf16.vlgmr.msra.gmra.mrb[4].mxu1 %vm1251_vm3, %v1235_v63 }
 0x4c7   : > { %v1289_v58 = vpop.f32.mrb[4].mxu1 }
 0x4c8   : > { %v1290_v51 = vadd.f32 %v1672_v31, %v1289_v58  ;;  %v1767_v23 = vpop.f32.mrb[5].mxu1 }
 0x4c9   : > { %v1292_v44 = vpop.f32.mrb[6].mxu1 }
 0x4ca   : > { %v1675_v59 = vmul.f32 -1.442695, %v1290_v51  ;;  %v1768_v0 = vpop.f32.mrb[7].mxu1 }
 0x4cc   : > { %1990 = vpow2.f32 %v1675_v59 }
 0x4d6   : > { %v1991_v5 = vpop.eup %1990 }
 0x4d7   : > { %v1298_v57 = vadd.f32 1.0, %v1991_v5 }
 0x4d9   : > { %1992 = vrcp.f32 %v1298_v57 }
 0x4e3   : > { %v1993_v7 = vpop.eup %1992 }
 0x4e4   : > { %v1304_v35 = vrot.slane %v1993_v7, %v1303_v2  ;;  %v1378_v19 = vrot.slane %v1993_v7, %v1377_v15 }
 0x4e6   : > { %v1305_v13 = vmul.f32 %v1304_v35, %v3077_v48  ;;  %v1306_v40 = vmul.f32 %v1304_v35, %v3082_v45  ;;  %v1307_v18 = vmul.f32 %v1304_v35, %v3098_v4  ;;  %v1379_v21 = vmul.f32 %v1378_v19, %v3108_v61 }
 0x4e7   : > { %v1380_v39 = vmul.f32 %v1378_v19, %v3114_v29  ;;  %v1308_v55 = vmul.f32 %v1304_v35, %v3103_v8  ;;  %v1381_v49 = vmul.f32 %v1378_v19, %v3126_v11  ;;  %v1309_v24 = vmul.f32 %v1304_v35, %v3112_v47 }
 0x4e8   : > { %v1313_v28 = vadd.f32 %v1306_v40, %v1305_v13  ;;  %v1382_v48 = vmul.f32 %v1378_v19, %v3136_v17  ;;  %v1310_v45 = vmul.f32 %v1304_v35, %v3117_v38  ;;  %v1383_v12 = vmul.f32 %v1378_v19, %v3138_v6 }
 0x4e9   : > { %v1387_v16 = vadd.f32 %v1380_v39, %v1379_v21  ;;  %v1311_v29 = vmul.f32 %v1304_v35, %v3123_v46  ;;  %v1384_v8 = vmul.f32 %v1378_v19, %v3144_v1  ;;  %v1312_v11 = vmul.f32 %v1304_v35, %v3133_v62 }
 0x4ea   : > { %v1314_v25 = vadd.f32 %v1313_v28, %v1307_v18  ;;  %v1385_v47 = vmul.f32 %v1378_v19, %v3148_v52  ;;  %v1386_v9 = vmul.f32 %v1378_v19, %v3151_v27 }
 0x4eb   : > { %v1388_v3 = vadd.f32 %v1387_v16, %v1381_v49 }
 0x4ec   : > { %v1315_v36 = vadd.f32 %v1314_v25, %v1308_v55 }
 0x4ed   : > { %v1389_v61 = vadd.f32 %v1388_v3, %v1382_v48 }
 0x4ee   : > { %v1316_v4 = vadd.f32 %v1315_v36, %v1309_v24 }
 0x4ef   : > { %v1390_v34 = vadd.f32 %v1389_v61, %v1383_v12 }
 0x4f0   : > { %v1317_v32 = vadd.f32 %v1316_v4, %v1310_v45 }
 0x4f1   : > { %v1391_v54 = vadd.f32 %v1390_v34, %v1384_v8 }
 0x4f2   : > { %v1318_v10 = vadd.f32 %v1317_v32, %v1311_v29 }
 0x4f3   : > { %v1392_v38 = vadd.f32 %v1391_v54, %v1385_v47 }
 0x4f4   : > { %v1319_v17 = vadd.f32 %v1318_v10, %v1312_v11 }
 0x4f5   : > { %v1393_v43 = vadd.f32 %v1392_v38, %v1386_v9 }
 0x4f6   : > { %v1320_v42 = vrot.slane %v1319_v17, 4 }
 0x4f7   : > { %v1394_v41 = vrot.slane %v1393_v43, 4 }
 0x4f8   : > { %v1321_v6 = vadd.f32 %v1320_v42, %v1319_v17 }
 0x4f9   : > { %v1395_v46 = vadd.f32 %v1394_v41, %v1393_v43 }
 0x4fa   : > { %v1322_v14 = vrot.slane %v1321_v6, 2 }
 0x4fb   : > { %v1396_v37 = vrot.slane %v1395_v46, 2 }
 0x4fc   : > { %v1323_v30 = vadd.f32 %v1322_v14, %v1321_v6 }
 0x4fd   : > { %v1397_v60 = vadd.f32 %v1396_v37, %v1395_v46 }
 0x4fe   : > { %v1324_v1 = vrot.slane %v1323_v30, 1 }
 0x4ff   : > { %v1398_v62 = vrot.slane %v1397_v60, 1 }
 0x500   : > { %v1325_v20 = vadd.f32 %v1324_v1, %v1323_v30 }
 0x501   : > { %v1399_v27 = vadd.f32 %v1398_v62, %v1397_v60 }
 0x502   : > { %v1326_v33 = vmul.f32 0.015625, %v1325_v20 }
 0x503   : > { %v1400_v44 = vmul.f32 0.015625, %v1399_v27 }
 0x504   : > { %v3173_v50 = vsub.f32 %v1305_v13, %v1326_v33  ;;  %v3175_v52 = vsub.f32 %v1306_v40, %v1326_v33  ;;  %v3177_v22 = vsub.f32 %v1307_v18, %v1326_v33  ;;  %v3179_v53 = vsub.f32 %v1308_v55, %v1326_v33 }
 0x505   : > { %v3185_v58 = vsub.f32 %v1309_v24, %v1326_v33  ;;  %v1332_v59 = vsub.f32 %v1310_v45, %v1326_v33  ;;  %v3191_v57 = vsub.f32 %v1379_v21, %v1400_v44  ;;  %v3193_v26 = vsub.f32 %v1380_v39, %v1400_v44 }
 0x506   : > { %v1335_v63 = vmul.f32 %v3173_v50, %v3173_v50  ;;  %v1336_v31 = vmul.f32 %v3175_v52, %v3175_v52  ;;  %v1337_v51 = vmul.f32 %v3177_v22, %v3177_v22  ;;  %v1338_v0 = vmul.f32 %v3179_v53, %v3179_v53 }
 0x507   : > { %v3195_v56 = vsub.f32 %v1381_v49, %v1400_v44  ;;  %v1333_v2 = vsub.f32 %v1311_v29, %v1326_v33  ;;  %v1339_v15 = vmul.f32 %v3185_v58, %v3185_v58  ;;  %v3199_v35 = vsub.f32 %v1382_v48, %v1400_v44 }
 0x508   : > { %v1343_v23 = vadd.f32 %v1336_v31, %v1335_v63  ;;  %v1409_v19 = vmul.f32 %v3191_v57, %v3191_v57  ;;  %v1410_v13 = vmul.f32 %v3193_v26, %v3193_v26  ;;  %v1334_v40 = vsub.f32 %v1312_v11, %v1326_v33 }
 0x509   : > { %v1340_v18 = vmul.f32 %v1332_v59, %v1332_v59  ;;  %v3205_v21 = vsub.f32 %v1383_v12, %v1400_v44  ;;  %v1411_v39 = vmul.f32 %v3195_v56, %v3195_v56  ;;  %v1341_v25 = vmul.f32 %v1333_v2, %v1333_v2 }
 0x50a   : > { %v1344_v5 = vadd.f32 %v1343_v23, %v1337_v51  ;;  %v1417_v55 = vadd.f32 %v1410_v13, %v1409_v19  ;;  %v3209_v16 = vsub.f32 %v1384_v8, %v1400_v44  ;;  %v1412_v24 = vmul.f32 %v3199_v35, %v3199_v35 }
 0x50b   : > { %v1342_v48 = vmul.f32 %v1334_v40, %v1334_v40  ;;  %v1407_v45 = vsub.f32 %v1385_v47, %v1400_v44  ;;  %v1413_v4 = vmul.f32 %v3205_v21, %v3205_v21  ;;  %v1408_v29 = vsub.f32 %v1386_v9, %v1400_v44 }
 0x50c   : > { %v1345_v7 = vadd.f32 %v1344_v5, %v1338_v0  ;;  %v1418_v36 = vadd.f32 %v1417_v55, %v1411_v39  ;;  %v1414_v32 = vmul.f32 %v3209_v16, %v3209_v16 }
 0x50d   : > { %v1415_v8 = vmul.f32 %v1407_v45, %v1407_v45  ;;  %v1416_v17 = vmul.f32 %v1408_v29, %v1408_v29 }
 0x50e   : > { %v1346_v28 = vadd.f32 %v1345_v7, %v1339_v15  ;;  %v1419_v12 = vadd.f32 %v1418_v36, %v1412_v24 }
 0x510   : > { %v1347_v49 = vadd.f32 %v1346_v28, %v1340_v18  ;;  %v1420_v34 = vadd.f32 %v1419_v12, %v1413_v4 }
 0x512   : > { %v1348_v3 = vadd.f32 %v1347_v49, %v1341_v25  ;;  %v1421_v10 = vadd.f32 %v1420_v34, %v1414_v32 }
 0x514   : > { %v1349_v61 = vadd.f32 %v1348_v3, %v1342_v48  ;;  %v1422_v38 = vadd.f32 %v1421_v10, %v1415_v8 }
 0x516   : > { %v1350_v11 = vrot.slane %v1349_v61, 4  ;;  %v1423_v43 = vadd.f32 %v1422_v38, %v1416_v17 }
 0x518   : > { %v1351_v54 = vadd.f32 %v1350_v11, %v1349_v61  ;;  %v1424_v6 = vrot.slane %v1423_v43, 4 }
 0x51a   : > { %v1352_v42 = vrot.slane %v1351_v54, 2  ;;  %v1425_v14 = vadd.f32 %v1424_v6, %v1423_v43 }
 0x51c   : > { %v1353_v47 = vadd.f32 %v1352_v42, %v1351_v54  ;;  %v1426_v30 = vrot.slane %v1425_v14, 2 }
 0x51e   : > { %v1354_v41 = vrot.slane %v1353_v47, 1  ;;  %v1427_v37 = vadd.f32 %v1426_v30, %v1425_v14 }
 0x520   : > { %v1355_v46 = vadd.f32 %v1354_v41, %v1353_v47  ;;  %v1428_v60 = vrot.slane %v1427_v37, 1 }
 0x522   : > { %v1356_v9 = vmul.f32 0.015625, %v1355_v46  ;;  %v1429_v20 = vadd.f32 %v1428_v60, %v1427_v37 }
 0x524   : > { %v1357_v1 = vadd.f32 1e-05, %v1356_v9  ;;  %v1430_v62 = vmul.f32 0.015625, %v1429_v20 }
 0x526   : > { %1994 = vrsqrt.f32 %v1357_v1  ;;  %v1431_v33 = vadd.f32 1e-05, %v1430_v62 }
 0x528   : > { %1996 = vrsqrt.f32 %v1431_v33 }
 0x530   : > { %v1995_v27 = vpop.eup %1994 }
 0x531   : > { %v1359_v63 = vmul.f32 %v1995_v27, %v3173_v50  ;;  %v1360_v31 = vmul.f32 %v1995_v27, %v3175_v52  ;;  %v1361_v51 = vmul.f32 %v1995_v27, %v3177_v22  ;;  %v1362_v23 = vmul.f32 %v1995_v27, %v3179_v53 }
 0x532   : > { %v1363_v44 = vmul.f32 %v1995_v27, %v3185_v58  ;;  %v1364_v0 = vmul.f32 %v1995_v27, %v1332_v59  ;;  %v1365_v5 = vmul.f32 %v1995_v27, %v1333_v2  ;;  %v1366_v15 = vmul.f32 %v1995_v27, %v1334_v40  ;;  %v1997_v50 = vpop.eup %1996 }
 0x533   : > { %1367 = vst [vmem:[%s456_s17] sm:$0xff] %v1359_v63  ;;  %1368 = vst [vmem:[%s456_s17 + $0x8] sm:$0xff] %v1360_v31  ;;  %v1433_v52 = vmul.f32 %v1997_v50, %v3191_v57  ;;  %v1434_v22 = vmul.f32 %v1997_v50, %v3193_v26  ;;  %v1435_v53 = vmul.f32 %v1997_v50, %v3195_v56 }
 0x534   : > { %1369 = vst [vmem:[%s456_s17 + $0x10] sm:$0xff] %v1361_v51  ;;  %1370 = vst [vmem:[%s456_s17 + $0x18] sm:$0xff] %v1362_v23  ;;  %v1436_v58 = vmul.f32 %v1997_v50, %v3199_v35  ;;  %v1437_v59 = vmul.f32 %v1997_v50, %v3205_v21  ;;  %v1438_v57 = vmul.f32 %v1997_v50, %v3209_v16 }
 0x535   : > { %1371 = vst [vmem:[%s456_s17 + $0x20] sm:$0xff] %v1363_v44  ;;  %1372 = vst [vmem:[%s456_s17 + $0x28] sm:$0xff] %v1364_v0  ;;  %v1439_v26 = vmul.f32 %v1997_v50, %v1407_v45  ;;  %v1440_v2 = vmul.f32 %v1997_v50, %v1408_v29 }
 0x536   : > { %1373 = vst [vmem:[%s456_s17 + $0x30] sm:$0xff] %v1365_v5  ;;  %1374 = vst [vmem:[%s456_s17 + $0x38] sm:$0xff] %v1366_v15 }
 0x537   : > { %1676 = vst [vmem:[%s456_s17 + $0x40] sm:$0xff] %v1433_v52  ;;  %1677 = vst [vmem:[%s456_s17 + $0x48] sm:$0xff] %v1434_v22 }
 0x538   : > { %1678 = vst [vmem:[%s456_s17 + $0x50] sm:$0xff] %v1435_v53  ;;  %1679 = vst [vmem:[%s456_s17 + $0x58] sm:$0xff] %v1436_v58 }
 0x539   : > { %1680 = vst [vmem:[%s456_s17 + $0x60] sm:$0xff] %v1437_v59  ;;  %1681 = vst [vmem:[%s456_s17 + $0x68] sm:$0xff] %v1438_v57 }
 0x53a   : > { %1682 = vst [vmem:[%s456_s17 + $0x70] sm:$0xff] %v1439_v26  ;;  %1683 = vst [vmem:[%s456_s17 + $0x78] sm:$0xff] %v1440_v2 }
 0x53b   : > { %2265 = shalt.err (!%p2262_p10)
}
 0x53c   : > { %s2266_s26 = scalar_lea.hbm %s3231_s28, 2048  ;;  %s2270_s20 = scalar_lea.hbm %s3316_s13, 4096 }
 0x53d   : > { %p2267_p11 = scmp.ne.s32.totalorder %s3231_s28, %s2266_s26  ;;  %p2271_p7 = scmp.lt.u32.totalorder %s3231_s28, %s3316_s13 }
 0x53e   : > { %p2272_p6 = scmp.lt.u32.totalorder %s2270_s20, %s2266_s26  ;;  %p2274_p12 = scmp.lt.u32.totalorder %s2266_s26, %s3231_s28 }
 0x53f   : > { %p2268_p3 = pnand %p2267_p11, %p3317_p1 }
 0x540   : > { %p2273_p9 = por %p2272_p6, %p2271_p7 }
 0x541   : > { %p2269_p5 = pneg %p2268_p3 }
 0x542   : > { %p2275_p13 = por %p2274_p12, %p2273_p9 }
 0x544   : > { %p2276_p0 = pnand %p2275_p13, %p2269_p5 }
 0x546   : > { %2279 = shalt.err (!%p2276_p0)
}
 0x547   : > { %s2350_s1 = smov 128   ;;  %s2351_s23 = smov 8  }
 0x548   : > { %1803 = dma.vmem_to_hbm [thread:$0]  (%p3317_p1), %s3233_s29, 2048, %s3231_s28, %s1451_s15, %s2350_s1, %s2350_s1, %s2351_s23  }
 0x549 PF: > { %s1480_s27 = sand.u32 1, %s2322_s30   ;;  %p3318_p2 = scmp.ne.s32.totalorder %s3304_s21, 0 }
 0x54a   : > { %p3319_p8 = scmp.ge.s32.totalorder %s2334_s12, 2  ;;  %s1481_s22 = scalar_lea.sflag [#allocation4], %s1480_s27 }
 0x54c   : > { %p1835_p4 = pnand %p3319_p8, %p3318_p2 }
 0x54e   : > { %2317 = dma.done.wait (!%p1835_p4), %s1481_s22, 2048  }
 0x54f   : > { %2319 = vsyncadd (!%p1835_p4), %s1481_s22, 4294965248  ;;  %p26_p10 = scmp.ge.s32.totalorder %s2624_s19, 4   ;;  %s3320_s30 = smov %s2326_s10 }
 0x550   : > { %s3321_s10 = smov %s2330_s11  ;;  %s3322_s11 = smov %s2635_s14 }
 0x551   : > { %s3323_s12 = smov %s2624_s19  ;;  %28 = sbr.rel (!%p26_p10) target bundleno = 12 (0xc), region = 134 }
 0x558   :  { %1486 = vsyncpa [#allocation3], 1 }
 0x559   :  { %1488 = vsyncpa [#allocation3 + $0x1], 1 }
 0x55a   :  { %1489 = vsyncpa [#allocation6], 1 }
 0x55b   :  { %1490 = vsyncpa [#allocation9], 1 }
 0x55c   :  { %1491 = vsyncpa [#allocation12], 1 }
 0x55d   :  { %1492 = vsyncpa [#allocation15], 1 }
 0x55e   :  { %1493 = vsyncpa [#allocation4], 1 }
 0x55f   :  { %1495 = vsyncpa [#allocation4 + $0x1], 1 }

</bundles_post_ra>
